<compile_context>
chip_gen: v6e
topology: v6e:2x2x1
jax: 0.10.0
libtpu: 0.0.40
codegen_flags: <defaults>
</compile_context>

<pallas_src>
import functools

import jax
import jax.numpy as jnp
from jax.experimental import pallas as pl
from jax.experimental.pallas import tpu as pltpu


def _round_up(n, m):
    return ((n + m - 1) // m) * m


def _layernorm(x, gamma, beta, eps):
    mean = jnp.mean(x, axis=-1, keepdims=True)
    var = jnp.mean((x - mean) ** 2, axis=-1, keepdims=True)
    return (x - mean) * jax.lax.rsqrt(var + eps) * gamma + beta


# ----------------------------------------------------------------------------- #
# Pallas kernels
# ----------------------------------------------------------------------------- #
def _embed_kernel(xp_ref, w_ref, b_ref, cls_ref, pos_ref, o_ref, *, seq_len):
    """Input linear + class token + positional embedding for one batch element.

    xp_ref : [S_pad, in_dim]  (row 0 and rows >= seq_len are zero padding)
    w_ref  : [in_dim, D]      (pre-transposed)
    b_ref  : [1, D]
    cls_ref: [1, D]
    pos_ref: [S_pad, D]       (zero padded past seq_len)
    o_ref  : [S_pad, D]
    """
    tok = jnp.dot(xp_ref[...], w_ref[...], preferred_element_type=jnp.float32)
    tok = tok + b_ref[...]
    row = jax.lax.broadcasted_iota(jnp.int32, (tok.shape[0], 1), 0)
    out = jnp.where(row == 0, cls_ref[...], tok) + pos_ref[...]
    out = jnp.where(row < seq_len, out, 0.0)
    o_ref[...] = out.astype(o_ref.dtype)


def _encoder_kernel(x_ref, ln1g_ref, ln1b_ref, wqkv_ref, bqkv_ref, wo_ref,
                    bo_ref, ln2g_ref, ln2b_ref, w1_ref, b1_ref, w2_ref, b2_ref,
                    o_ref, *, num_heads, seq_len, eps):
    """Fused pre-norm ViT encoder block for one batch element.  x: [S_pad, D]."""
    S_pad, D = x_ref.shape
    H = num_heads
    Dh = D // H
    scale = 1.0 / (Dh ** 0.5)

    x = x_ref[...].astype(jnp.float32)

    # ---------------- multi-head self-attention ---------------- #
    h = _layernorm(x, ln1g_ref[...], ln1b_ref[...], eps)

    # Packed QKV weights [3, D, D]: one weight DMA, h stays in registers.
    q = jnp.dot(h, wqkv_ref[0], preferred_element_type=jnp.float32) + bqkv_ref[0]
    k = jnp.dot(h, wqkv_ref[1], preferred_element_type=jnp.float32) + bqkv_ref[1]
    v = jnp.dot(h, wqkv_ref[2], preferred_element_type=jnp.float32) + bqkv_ref[2]

    lane = jax.lax.broadcasted_iota(jnp.int32, (1, D), 1)
    key_valid = jax.lax.broadcasted_iota(jnp.int32, (1, S_pad), 1) < seq_len

    # Per-head attention via lane-masked full-D matmuls: masking other heads'
    # lanes in q/v gives exactly the per-head contraction, and each head's
    # output lands in its own lane slice, so summing heads reproduces the
    # concatenated [S_pad, D] layout with no reshapes/transposes.
    attn = jnp.zeros((S_pad, D), jnp.float32)
    for hd in range(H):
        head_mask = ((lane >= hd * Dh) & (lane < (hd + 1) * Dh)).astype(jnp.float32)
        qh = q * head_mask
        vh = v * head_mask
        s = jax.lax.dot_general(qh, k, (((1,), (1,)), ((), ())),
                                preferred_element_type=jnp.float32) * scale
        s = jnp.where(key_valid, s, -1e30)          # mask padded key columns
        m = jnp.max(s, axis=-1, keepdims=True)
        p = jnp.exp(s - m)
        denom = jnp.sum(p, axis=-1, keepdims=True)
        p = p * pl.reciprocal(denom, approx=True)   # EUP reciprocal
        attn = attn + jnp.dot(p, vh, preferred_element_type=jnp.float32)

    attn = jnp.dot(attn, wo_ref[...], preferred_element_type=jnp.float32)
    attn = attn + bo_ref[...]
    x1 = x + attn                                   # residual (in VMEM)

    # --------------------------- MLP ---------------------------- #
    h2 = _layernorm(x1, ln2g_ref[...], ln2b_ref[...], eps)
    m1 = jnp.dot(h2, w1_ref[...], preferred_element_type=jnp.float32) + b1_ref[...]
    m1 = jax.nn.gelu(m1, approximate=True)
    m2 = jnp.dot(m1, w2_ref[...], preferred_element_type=jnp.float32) + b2_ref[...]

    o_ref[...] = (x1 + m2).astype(o_ref.dtype)      # residual (in VMEM)


def _head_kernel(x_ref, g_ref, b_ref, w_ref, bias_ref, o_ref, *, eps):
    """Final LayerNorm + classifier linear.  x: [B, D] -> [B, num_classes]."""
    y = _layernorm(x_ref[...].astype(jnp.float32), g_ref[...], b_ref[...], eps)
    o_ref[...] = (jnp.dot(y, w_ref[...], preferred_element_type=jnp.float32)
                  + bias_ref[...]).astype(o_ref.dtype)


# ----------------------------------------------------------------------------- #
# Pallas wrappers
# ----------------------------------------------------------------------------- #
def embed_tokens(xp_padded, w, b, cls, pos_padded, *, seq_len):
    B, S_pad, in_dim = xp_padded.shape
    D = w.shape[1]
    return pl.pallas_call(
        functools.partial(_embed_kernel, seq_len=seq_len),
        grid=(B,),
        out_shape=jax.ShapeDtypeStruct((B, S_pad, D), jnp.float32),
        in_specs=[
            pl.BlockSpec((None, S_pad, in_dim), lambda i: (i, 0, 0)),
            pl.BlockSpec((in_dim, D), lambda i: (0, 0)),
            pl.BlockSpec((1, D), lambda i: (0, 0)),
            pl.BlockSpec((1, D), lambda i: (0, 0)),
            pl.BlockSpec((S_pad, D), lambda i: (0, 0)),
        ],
        out_specs=pl.BlockSpec((None, S_pad, D), lambda i: (i, 0, 0)),
        compiler_params=pltpu.CompilerParams(
            dimension_semantics=("parallel",)),
    )(xp_padded, w, b, cls, pos_padded)


def encoder_block(x, p, *, num_heads, seq_len, eps=1e-5):
    B, S_pad, D = x.shape
    M = p["w1"].shape[1]

    def full2(shape):
        return pl.BlockSpec(shape, lambda i: (0, 0))

    return pl.pallas_call(
        functools.partial(_encoder_kernel, num_heads=num_heads,
                          seq_len=seq_len, eps=eps),
        grid=(B,),
        out_shape=jax.ShapeDtypeStruct((B, S_pad, D), jnp.float32),
        in_specs=[
            pl.BlockSpec((None, S_pad, D), lambda i: (i, 0, 0)),
            full2((1, D)), full2((1, D)),                       # ln1 gamma/beta
            pl.BlockSpec((3, D, D), lambda i: (0, 0, 0)),       # packed QKV weight
            pl.BlockSpec((3, 1, D), lambda i: (0, 0, 0)),       # packed QKV bias
            full2((D, D)), full2((1, D)),                       # out proj
            full2((1, D)), full2((1, D)),                       # ln2 gamma/beta
            full2((D, M)), full2((1, M)),                       # mlp up
            full2((M, D)), full2((1, D)),                       # mlp down
        ],
        out_specs=pl.BlockSpec((None, S_pad, D), lambda i: (i, 0, 0)),
        compiler_params=pltpu.CompilerParams(
            dimension_semantics=("parallel",)),
    )(x, p["ln1_g"], p["ln1_b"], p["wqkv"], p["bqkv"], p["wo"], p["bo"],
      p["ln2_g"], p["ln2_b"], p["w1"], p["b1"], p["w2"], p["b2"])


def classifier_head(cls_tok, g, b, w, bias, *, eps=1e-5):
    B, D = cls_tok.shape
    C = w.shape[1]
    return pl.pallas_call(
        functools.partial(_head_kernel, eps=eps),
        grid=(1,),
        out_shape=jax.ShapeDtypeStruct((B, C), jnp.float32),
        in_specs=[
            pl.BlockSpec((B, D), lambda i: (0, 0)),
            pl.BlockSpec((1, D), lambda i: (0, 0)),
            pl.BlockSpec((1, D), lambda i: (0, 0)),
            pl.BlockSpec((D, C), lambda i: (0, 0)),
            pl.BlockSpec((1, C), lambda i: (0, 0)),
        ],
        out_specs=pl.BlockSpec((B, C), lambda i: (0, 0)),
    )(cls_tok, g, b, w, bias)


# ----------------------------------------------------------------------------- #
# Model: parameter init (pre-packed / pre-transposed) + forward glue
# ----------------------------------------------------------------------------- #
def init_params(key, *, num_classes, img_size, patch_size,
                num_inputlayer_units, num_heads, num_mlp_units, num_layers):
    D = num_inputlayer_units
    num_patches = (img_size // patch_size) ** 2
    input_dim = 3 * patch_size ** 2
    M = num_mlp_units
    S = num_patches + 1
    S_pad = _round_up(S, 8)

    def dense_t(k, out_dim, in_dim):
        # nn.Linear stores [out, in]; pre-transpose once to [in, out].
        return jnp.transpose(0.02 * jax.random.normal(k, (out_dim, in_dim), jnp.float32))

    keys = jax.random.split(key, 2 + 6 * num_layers)
    ki = iter(keys)

    params = {
        "input_w": dense_t(next(ki), D, input_dim),        # [in_dim, D]
        "input_b": jnp.zeros((1, D), jnp.float32),
        # class_token / pos_embed zero-initialized, exactly as in the module.
        "class_token": jnp.zeros((1, D), jnp.float32),
        "pos_embed": jnp.zeros((S_pad, D), jnp.float32),   # padded past S with zeros
        "norm_g": jnp.ones((1, D), jnp.float32),
        "norm_b": jnp.zeros((1, D), jnp.float32),
        "out_w": dense_t(next(ki), num_classes, D),        # [D, num_classes]
        "out_b": jnp.zeros((1, num_classes), jnp.float32),
        "layers": [],
    }
    for _ in range(num_layers):
        wq = dense_t(next(ki), D, D)
        wk = dense_t(next(ki), D, D)
        wv = dense_t(next(ki), D, D)
        layer = {
            "ln1_g": jnp.ones((1, D), jnp.float32),
            "ln1_b": jnp.zeros((1, D), jnp.float32),
            "wqkv": jnp.stack([wq, wk, wv], axis=0),       # [3, D, D], packed once
            "bqkv": jnp.zeros((3, 1, D), jnp.float32),
            "wo": dense_t(next(ki), D, D),
            "bo": jnp.zeros((1, D), jnp.float32),
            "ln2_g": jnp.ones((1, D), jnp.float32),
            "ln2_b": jnp.zeros((1, D), jnp.float32),
            "w1": dense_t(next(ki), M, D),                 # [D, M]
            "b1": jnp.zeros((1, M), jnp.float32),
            "w2": dense_t(next(ki), D, M),                 # [M, D]
            "b2": jnp.zeros((1, D), jnp.float32),
        }
        params["layers"].append(layer)
    return params


def vit_forward(params, x, *, patch_size, num_heads):
    """x: [B, 3, H, W] float32 (NCHW, like the PyTorch module)."""
    bs, c, h, w = x.shape
    ps = patch_size
    # patchify — identical to torch view/permute/reshape (plain-JAX glue, one-time)
    xp = x.reshape(bs, c, h // ps, ps, w // ps, ps)
    xp = xp.transpose(0, 2, 4, 1, 3, 5)
    xp = xp.reshape(bs, (h // ps) * (w // ps), c * ps * ps)

    num_patches = xp.shape[1]
    S = num_patches + 1                      # +1 class token
    S_pad = _round_up(S, 8)                  # sublane-align the sequence once

    # row 0 reserved for the class token, tail rows zero-padded
    xp_padded = jnp.pad(xp, ((0, 0), (1, S_pad - 1 - num_patches), (0, 0)))

    tok = embed_tokens(xp_padded, params["input_w"], params["input_b"],
                       params["class_token"], params["pos_embed"], seq_len=S)

    for layer_params in params["layers"]:
        tok = encoder_block(tok, layer_params, num_heads=num_heads, seq_len=S)

    cls_out = tok[:, 0, :]                                         # [B, D]
    logits = classifier_head(cls_out, params["norm_g"], params["norm_b"],
                             params["out_w"], params["out_b"])     # [B, num_classes]
    return logits


# ----------------------------------------------------------------------------- #
# Main
# ----------------------------------------------------------------------------- #
if __name__ == "__main__":
    num_classes = 10
    img_size = 16
    patch_size = 4
    num_inputlayer_units = 32
    num_heads = 4
    num_mlp_units = 64
    num_layers = 2
    batch = 2

    key = jax.random.PRNGKey(0)
    k_param, k_input = jax.random.split(key)

    params = init_params(
        k_param,
        num_classes=num_classes, img_size=img_size, patch_size=patch_size,
        num_inputlayer_units=num_inputlayer_units, num_heads=num_heads,
        num_mlp_units=num_mlp_units, num_layers=num_layers,
    )

    x = jax.random.normal(k_input, (batch, 3, img_size, img_size), jnp.float32)

    fwd = jax.jit(functools.partial(vit_forward, patch_size=patch_size,
                                    num_heads=num_heads))
    logits = fwd(params, x)
    jax.block_until_ready(logits)

    assert logits.shape == (batch, num_classes)
    assert logits.dtype == jnp.float32
    print("KERNEL_OK")
</pallas_src>

<mosaic_0001>
module attributes {stable_mosaic.version = 11 : i64} {
  func.func @_embed_kernel(%arg0: i32, %arg1: memref<1x24x48xf32, #tpu.memory_space<vmem>>, %arg2: memref<48x32xf32, #tpu.memory_space<vmem>>, %arg3: memref<1x32xf32, #tpu.memory_space<vmem>>, %arg4: memref<1x32xf32, #tpu.memory_space<vmem>>, %arg5: memref<24x32xf32, #tpu.memory_space<vmem>>, %arg6: memref<1x24x32xf32, #tpu.memory_space<vmem>>) attributes {dimension_semantics = [#tpu.dimension_semantics<parallel>], iteration_bounds = array<i64: 2>, scalar_prefetch = 0 : i64, scratch_operands = 0 : i64, tpu.core_type = #tpu.core_type<tc>, window_params = [{transform_indices = @transform_0, window_bounds = array<i64: 1, 24, 48>}, {pipeline_mode = #tpu.pipeline_mode<synchronous>, transform_indices = @transform_1, window_bounds = array<i64: 48, 32>}, {pipeline_mode = #tpu.pipeline_mode<synchronous>, transform_indices = @transform_2, window_bounds = array<i64: 1, 32>}, {pipeline_mode = #tpu.pipeline_mode<synchronous>, transform_indices = @transform_3, window_bounds = array<i64: 1, 32>}, {pipeline_mode = #tpu.pipeline_mode<synchronous>, transform_indices = @transform_4, window_bounds = array<i64: 24, 32>}, {transform_indices = @transform_5, window_bounds = array<i64: 1, 24, 32>}]} {
    %c0 = arith.constant 0 : index
    %c0_0 = arith.constant 0 : index
    %c0_1 = arith.constant 0 : index
    %0 = vector.load %arg1[%c0, %c0_0, %c0_1] : memref<1x24x48xf32, #tpu.memory_space<vmem>>, vector<1x24x48xf32>
    %1 = vector.shape_cast %0 : vector<1x24x48xf32> to vector<24x48xf32>
    %c0_2 = arith.constant 0 : index
    %c0_3 = arith.constant 0 : index
    %2 = vector.load %arg2[%c0_2, %c0_3] : memref<48x32xf32, #tpu.memory_space<vmem>>, vector<48x32xf32>
    %cst = arith.constant dense<0.000000e+00> : vector<24x32xf32>
    %3 = tpu.matmul %1, %2, %cst {dimension_numbers = #tpu.dot_dimension_numbers<[1], [0], [0], [1], [0, 0, 1, 1], [], []>} : vector<24x48xf32>, vector<48x32xf32>, vector<24x32xf32> -> vector<24x32xf32>
    %c0_4 = arith.constant 0 : index
    %c0_5 = arith.constant 0 : index
    %4 = vector.load %arg3[%c0_4, %c0_5] : memref<1x32xf32, #tpu.memory_space<vmem>>, vector<1x32xf32>
    %5 = vector.broadcast %4 : vector<1x32xf32> to vector<24x32xf32>
    %6 = arith.addf %3, %5 : vector<24x32xf32>
    %7 = tpu.iota {dimensions = array<i32: 0>} : vector<24x1xi32>
    %c0_i32 = arith.constant 0 : i32
    %8 = vector.broadcast %c0_i32 : i32 to vector<24x1xi32>
    %9 = arith.cmpi eq, %7, %8 : vector<24x1xi32>
    %c0_6 = arith.constant 0 : index
    %c0_7 = arith.constant 0 : index
    %10 = vector.load %arg4[%c0_6, %c0_7] : memref<1x32xf32, #tpu.memory_space<vmem>>, vector<1x32xf32>
    %11 = vector.shape_cast %9 : vector<24x1xi1> to vector<24x1xi1>
    %12 = vector.broadcast %11 : vector<24x1xi1> to vector<24x32xi1>
    %13 = vector.shape_cast %10 : vector<1x32xf32> to vector<1x32xf32>
    %14 = vector.broadcast %13 : vector<1x32xf32> to vector<24x32xf32>
    %15 = arith.select %12, %14, %6 : vector<24x32xi1>, vector<24x32xf32>
    %c0_8 = arith.constant 0 : index
    %c0_9 = arith.constant 0 : index
    %16 = vector.load %arg5[%c0_8, %c0_9] : memref<24x32xf32, #tpu.memory_space<vmem>>, vector<24x32xf32>
    %17 = arith.addf %15, %16 : vector<24x32xf32>
    %c17_i32 = arith.constant 17 : i32
    %18 = vector.broadcast %c17_i32 : i32 to vector<24x1xi32>
    %19 = arith.cmpi slt, %7, %18 : vector<24x1xi32>
    %cst_10 = arith.constant 0.000000e+00 : f32
    %20 = vector.shape_cast %19 : vector<24x1xi1> to vector<24x1xi1>
    %21 = vector.broadcast %20 : vector<24x1xi1> to vector<24x32xi1>
    %22 = vector.broadcast %cst_10 : f32 to vector<24x32xf32>
    %23 = arith.select %21, %17, %22 : vector<24x32xi1>, vector<24x32xf32>
    %c0_11 = arith.constant 0 : index
    %c0_12 = arith.constant 0 : index
    %c0_13 = arith.constant 0 : index
    %24 = vector.load %arg6[%c0_11, %c0_12, %c0_13] : memref<1x24x32xf32, #tpu.memory_space<vmem>>, vector<1x24x32xf32>
    %25 = vector.shape_cast %24 : vector<1x24x32xf32> to vector<24x32xf32>
    %26 = vector.shape_cast %23 : vector<24x32xf32> to vector<1x24x32xf32>
    tpu.vector_store %arg6[%c0_11, %c0_12, %c0_13], %26 {strides = array<i32>} : memref<1x24x32xf32, #tpu.memory_space<vmem>>, vector<1x24x32xf32>,
    return
  }
  func.func @transform_0(%arg0: i32) -> (i32, i32, i32) {
    %c0_i32 = arith.constant 0 : i32
    %c0_i32_0 = arith.constant 0 : i32
    %c0_i32_1 = arith.constant 0 : i32
    return %arg0, %c0_i32, %c0_i32_0 : i32, i32, i32
  }
  func.func @transform_1(%arg0: i32) -> (i32, i32) {
    %c0_i32 = arith.constant 0 : i32
    %c0_i32_0 = arith.constant 0 : i32
    %c0_i32_1 = arith.constant 0 : i32
    return %c0_i32, %c0_i32_0 : i32, i32
  }
  func.func @transform_2(%arg0: i32) -> (i32, i32) {
    %c0_i32 = arith.constant 0 : i32
    %c0_i32_0 = arith.constant 0 : i32
    %c0_i32_1 = arith.constant 0 : i32
    return %c0_i32, %c0_i32_0 : i32, i32
  }
  func.func @transform_3(%arg0: i32) -> (i32, i32) {
    %c0_i32 = arith.constant 0 : i32
    %c0_i32_0 = arith.constant 0 : i32
    %c0_i32_1 = arith.constant 0 : i32
    return %c0_i32, %c0_i32_0 : i32, i32
  }
  func.func @transform_4(%arg0: i32) -> (i32, i32) {
    %c0_i32 = arith.constant 0 : i32
    %c0_i32_0 = arith.constant 0 : i32
    %c0_i32_1 = arith.constant 0 : i32
    return %c0_i32, %c0_i32_0 : i32, i32
  }
  func.func @transform_5(%arg0: i32) -> (i32, i32, i32) {
    %c0_i32 = arith.constant 0 : i32
    %c0_i32_0 = arith.constant 0 : i32
    %c0_i32_1 = arith.constant 0 : i32
    return %arg0, %c0_i32, %c0_i32_0 : i32, i32, i32
  }
}

module attributes {stable_mosaic.version = 11 : i64} {
  func.func @_encoder_kernel(%arg0: i32, %arg1: memref<1x24x32xf32, #tpu.memory_space<vmem>>, %arg2: memref<1x32xf32, #tpu.memory_space<vmem>>, %arg3: memref<1x32xf32, #tpu.memory_space<vmem>>, %arg4: memref<3x32x32xf32, #tpu.memory_space<vmem>>, %arg5: memref<3x1x32xf32, #tpu.memory_space<vmem>>, %arg6: memref<32x32xf32, #tpu.memory_space<vmem>>, %arg7: memref<1x32xf32, #tpu.memory_space<vmem>>, %arg8: memref<1x32xf32, #tpu.memory_space<vmem>>, %arg9: memref<1x32xf32, #tpu.memory_space<vmem>>, %arg10: memref<32x64xf32, #tpu.memory_space<vmem>>, %arg11: memref<1x64xf32, #tpu.memory_space<vmem>>, %arg12: memref<64x32xf32, #tpu.memory_space<vmem>>, %arg13: memref<1x32xf32, #tpu.memory_space<vmem>>, %arg14: memref<1x24x32xf32, #tpu.memory_space<vmem>>) attributes {dimension_semantics = [#tpu.dimension_semantics<parallel>], iteration_bounds = array<i64: 2>, scalar_prefetch = 0 : i64, scratch_operands = 0 : i64, tpu.core_type = #tpu.core_type<tc>, window_params = [{transform_indices = @transform_0, window_bounds = array<i64: 1, 24, 32>}, {pipeline_mode = #tpu.pipeline_mode<synchronous>, transform_indices = @transform_1, window_bounds = array<i64: 1, 32>}, {pipeline_mode = #tpu.pipeline_mode<synchronous>, transform_indices = @transform_2, window_bounds = array<i64: 1, 32>}, {pipeline_mode = #tpu.pipeline_mode<synchronous>, transform_indices = @transform_3, window_bounds = array<i64: 3, 32, 32>}, {pipeline_mode = #tpu.pipeline_mode<synchronous>, transform_indices = @transform_4, window_bounds = array<i64: 3, 1, 32>}, {pipeline_mode = #tpu.pipeline_mode<synchronous>, transform_indices = @transform_5, window_bounds = array<i64: 32, 32>}, {pipeline_mode = #tpu.pipeline_mode<synchronous>, transform_indices = @transform_6, window_bounds = array<i64: 1, 32>}, {pipeline_mode = #tpu.pipeline_mode<synchronous>, transform_indices = @transform_7, window_bounds = array<i64: 1, 32>}, {pipeline_mode = #tpu.pipeline_mode<synchronous>, transform_indices = @transform_8, window_bounds = array<i64: 1, 32>}, {pipeline_mode = #tpu.pipeline_mode<synchronous>, transform_indices = @transform_9, window_bounds = array<i64: 32, 64>}, {pipeline_mode = #tpu.pipeline_mode<synchronous>, transform_indices = @transform_10, window_bounds = array<i64: 1, 64>}, {pipeline_mode = #tpu.pipeline_mode<synchronous>, transform_indices = @transform_11, window_bounds = array<i64: 64, 32>}, {pipeline_mode = #tpu.pipeline_mode<synchronous>, transform_indices = @transform_12, window_bounds = array<i64: 1, 32>}, {transform_indices = @transform_13, window_bounds = array<i64: 1, 24, 32>}]} {
    %c0 = arith.constant 0 : index
    %c0_0 = arith.constant 0 : index
    %c0_1 = arith.constant 0 : index
    %0 = vector.load %arg1[%c0, %c0_0, %c0_1] : memref<1x24x32xf32, #tpu.memory_space<vmem>>, vector<1x24x32xf32>
    %1 = vector.shape_cast %0 : vector<1x24x32xf32> to vector<24x32xf32>
    %c0_2 = arith.constant 0 : index
    %c0_3 = arith.constant 0 : index
    %2 = vector.load %arg2[%c0_2, %c0_3] : memref<1x32xf32, #tpu.memory_space<vmem>>, vector<1x32xf32>
    %c0_4 = arith.constant 0 : index
    %c0_5 = arith.constant 0 : index
    %3 = vector.load %arg3[%c0_4, %c0_5] : memref<1x32xf32, #tpu.memory_space<vmem>>, vector<1x32xf32>
    %cst = arith.constant dense<0.000000e+00> : vector<24xf32>
    %4 = vector.multi_reduction <add>, %1, %cst [1] : vector<24x32xf32> to vector<24xf32>
    %5 = vector.shape_cast %4 : vector<24xf32> to vector<24x1xf32>
    %cst_6 = arith.constant 3.200000e+01 : f32
    %6 = vector.broadcast %cst_6 : f32 to vector<24x1xf32>
    %7 = arith.divf %5, %6 : vector<24x1xf32>
    %8 = vector.broadcast %7 : vector<24x1xf32> to vector<24x32xf32>
    %9 = arith.subf %1, %8 : vector<24x32xf32>
    %10 = arith.mulf %9, %9 : vector<24x32xf32>
    %cst_7 = arith.constant dense<0.000000e+00> : vector<24xf32>
    %11 = vector.multi_reduction <add>, %10, %cst_7 [1] : vector<24x32xf32> to vector<24xf32>
    %12 = vector.shape_cast %11 : vector<24xf32> to vector<24x1xf32>
    %cst_8 = arith.constant 3.200000e+01 : f32
    %13 = vector.broadcast %cst_8 : f32 to vector<24x1xf32>
    %14 = arith.divf %12, %13 : vector<24x1xf32>
    %15 = vector.broadcast %7 : vector<24x1xf32> to vector<24x32xf32>
    %16 = arith.subf %1, %15 : vector<24x32xf32>
    %cst_9 = arith.constant 9.99999974E-6 : f32
    %17 = vector.broadcast %cst_9 : f32 to vector<24x1xf32>
    %18 = arith.addf %14, %17 : vector<24x1xf32>
    %19 = math.rsqrt %18 : vector<24x1xf32>
    %20 = vector.broadcast %19 : vector<24x1xf32> to vector<24x32xf32>
    %21 = arith.mulf %16, %20 : vector<24x32xf32>
    %22 = vector.broadcast %2 : vector<1x32xf32> to vector<24x32xf32>
    %23 = arith.mulf %21, %22 : vector<24x32xf32>
    %24 = vector.broadcast %3 : vector<1x32xf32> to vector<24x32xf32>
    %25 = arith.addf %23, %24 : vector<24x32xf32>
    %c0_10 = arith.constant 0 : index
    %c0_11 = arith.constant 0 : index
    %c0_12 = arith.constant 0 : index
    %26 = vector.load %arg4[%c0_10, %c0_11, %c0_12] : memref<3x32x32xf32, #tpu.memory_space<vmem>>, vector<1x32x32xf32>
    %27 = vector.shape_cast %26 : vector<1x32x32xf32> to vector<32x32xf32>
    %cst_13 = arith.constant dense<0.000000e+00> : vector<24x32xf32>
    %28 = tpu.matmul %25, %27, %cst_13 {dimension_numbers = #tpu.dot_dimension_numbers<[1], [0], [0], [1], [0, 0, 1, 1], [], []>} : vector<24x32xf32>, vector<32x32xf32>, vector<24x32xf32> -> vector<24x32xf32>
    %c0_14 = arith.constant 0 : index
    %c0_15 = arith.constant 0 : index
    %c0_16 = arith.constant 0 : index
    %29 = vector.load %arg5[%c0_14, %c0_15, %c0_16] : memref<3x1x32xf32, #tpu.memory_space<vmem>>, vector<1x1x32xf32>
    %30 = vector.shape_cast %29 : vector<1x1x32xf32> to vector<1x32xf32>
    %31 = vector.broadcast %30 : vector<1x32xf32> to vector<24x32xf32>
    %32 = arith.addf %28, %31 : vector<24x32xf32>
    %c1 = arith.constant 1 : index
    %c0_17 = arith.constant 0 : index
    %c0_18 = arith.constant 0 : index
    %33 = vector.load %arg4[%c1, %c0_17, %c0_18] : memref<3x32x32xf32, #tpu.memory_space<vmem>>, vector<1x32x32xf32>
    %34 = vector.shape_cast %33 : vector<1x32x32xf32> to vector<32x32xf32>
    %cst_19 = arith.constant dense<0.000000e+00> : vector<24x32xf32>
    %35 = tpu.matmul %25, %34, %cst_19 {dimension_numbers = #tpu.dot_dimension_numbers<[1], [0], [0], [1], [0, 0, 1, 1], [], []>} : vector<24x32xf32>, vector<32x32xf32>, vector<24x32xf32> -> vector<24x32xf32>
    %c1_20 = arith.constant 1 : index
    %c0_21 = arith.constant 0 : index
    %c0_22 = arith.constant 0 : index
    %36 = vector.load %arg5[%c1_20, %c0_21, %c0_22] : memref<3x1x32xf32, #tpu.memory_space<vmem>>, vector<1x1x32xf32>
    %37 = vector.shape_cast %36 : vector<1x1x32xf32> to vector<1x32xf32>
    %38 = vector.broadcast %37 : vector<1x32xf32> to vector<24x32xf32>
    %39 = arith.addf %35, %38 : vector<24x32xf32>
    %c2 = arith.constant 2 : index
    %c0_23 = arith.constant 0 : index
    %c0_24 = arith.constant 0 : index
    %40 = vector.load %arg4[%c2, %c0_23, %c0_24] : memref<3x32x32xf32, #tpu.memory_space<vmem>>, vector<1x32x32xf32>
    %41 = vector.shape_cast %40 : vector<1x32x32xf32> to vector<32x32xf32>
    %cst_25 = arith.constant dense<0.000000e+00> : vector<24x32xf32>
    %42 = tpu.matmul %25, %41, %cst_25 {dimension_numbers = #tpu.dot_dimension_numbers<[1], [0], [0], [1], [0, 0, 1, 1], [], []>} : vector<24x32xf32>, vector<32x32xf32>, vector<24x32xf32> -> vector<24x32xf32>
    %c2_26 = arith.constant 2 : index
    %c0_27 = arith.constant 0 : index
    %c0_28 = arith.constant 0 : index
    %43 = vector.load %arg5[%c2_26, %c0_27, %c0_28] : memref<3x1x32xf32, #tpu.memory_space<vmem>>, vector<1x1x32xf32>
    %44 = vector.shape_cast %43 : vector<1x1x32xf32> to vector<1x32xf32>
    %45 = vector.broadcast %44 : vector<1x32xf32> to vector<24x32xf32>
    %46 = arith.addf %42, %45 : vector<24x32xf32>
    %47 = tpu.iota {dimensions = array<i32: 1>} : vector<1x32xi32>
    %48 = tpu.iota {dimensions = array<i32: 1>} : vector<1x24xi32>
    %c17_i32 = arith.constant 17 : i32
    %49 = vector.broadcast %c17_i32 : i32 to vector<1x24xi32>
    %50 = arith.cmpi slt, %48, %49 : vector<1x24xi32>
    %cst_29 = arith.constant 0.000000e+00 : f32
    %51 = vector.broadcast %cst_29 : f32 to vector<24x32xf32>
    %c0_i32 = arith.constant 0 : i32
    %52 = vector.broadcast %c0_i32 : i32 to vector<1x32xi32>
    %53 = arith.cmpi sge, %47, %52 : vector<1x32xi32>
    %c8_i32 = arith.constant 8 : i32
    %54 = vector.broadcast %c8_i32 : i32 to vector<1x32xi32>
    %55 = arith.cmpi slt, %47, %54 : vector<1x32xi32>
    %56 = arith.andi %53, %55 : vector<1x32xi1>
    %57 = arith.extui %56 : vector<1x32xi1> to vector<1x32xi32>
    %58 = arith.sitofp %57 : vector<1x32xi32> to vector<1x32xf32>
    %59 = vector.broadcast %58 : vector<1x32xf32> to vector<24x32xf32>
    %60 = arith.mulf %32, %59 : vector<24x32xf32>
    %61 = vector.broadcast %58 : vector<1x32xf32> to vector<24x32xf32>
    %62 = arith.mulf %46, %61 : vector<24x32xf32>
    %cst_30 = arith.constant dense<0.000000e+00> : vector<24x24xf32>
    %63 = tpu.matmul %60, %39, %cst_30 {dimension_numbers = #tpu.dot_dimension_numbers<[1], [1], [0], [0], [0, 0, 1, 0], [], []>} : vector<24x32xf32>, vector<24x32xf32>, vector<24x24xf32> -> vector<24x24xf32>
    %cst_31 = arith.constant 0.353553385 : f32
    %64 = vector.broadcast %cst_31 : f32 to vector<24x24xf32>
    %65 = arith.mulf %63, %64 : vector<24x24xf32>
    %cst_32 = arith.constant -1.000000e+30 : f32
    %66 = vector.shape_cast %50 : vector<1x24xi1> to vector<1x24xi1>
    %67 = vector.broadcast %66 : vector<1x24xi1> to vector<24x24xi1>
    %68 = vector.broadcast %cst_32 : f32 to vector<24x24xf32>
    %69 = arith.select %67, %65, %68 : vector<24x24xi1>, vector<24x24xf32>
    %cst_33 = arith.constant dense<0xFF800000> : vector<24xf32>
    %70 = vector.multi_reduction <maximumf>, %69, %cst_33 [1] : vector<24x24xf32> to vector<24xf32>
    %71 = vector.shape_cast %70 : vector<24xf32> to vector<24x1xf32>
    %72 = vector.broadcast %71 : vector<24x1xf32> to vector<24x24xf32>
    %73 = arith.subf %69, %72 : vector<24x24xf32>
    %74 = math.exp %73 : vector<24x24xf32>
    %cst_34 = arith.constant dense<0.000000e+00> : vector<24xf32>
    %75 = vector.multi_reduction <add>, %74, %cst_34 [1] : vector<24x24xf32> to vector<24xf32>
    %76 = vector.shape_cast %75 : vector<24xf32> to vector<24x1xf32>
    %77 = tpu.reciprocal %76 {approx = true} : vector<24x1xf32> -> vector<24x1xf32>
    %78 = vector.broadcast %77 : vector<24x1xf32> to vector<24x24xf32>
    %79 = arith.mulf %74, %78 : vector<24x24xf32>
    %cst_35 = arith.constant dense<0.000000e+00> : vector<24x32xf32>
    %80 = tpu.matmul %79, %62, %cst_35 {dimension_numbers = #tpu.dot_dimension_numbers<[1], [0], [0], [1], [0, 0, 1, 1], [], []>} : vector<24x24xf32>, vector<24x32xf32>, vector<24x32xf32> -> vector<24x32xf32>
    %81 = arith.addf %51, %80 : vector<24x32xf32>
    %c8_i32_36 = arith.constant 8 : i32
    %82 = vector.broadcast %c8_i32_36 : i32 to vector<1x32xi32>
    %83 = arith.cmpi sge, %47, %82 : vector<1x32xi32>
    %c16_i32 = arith.constant 16 : i32
    %84 = vector.broadcast %c16_i32 : i32 to vector<1x32xi32>
    %85 = arith.cmpi slt, %47, %84 : vector<1x32xi32>
    %86 = arith.andi %83, %85 : vector<1x32xi1>
    %87 = arith.extui %86 : vector<1x32xi1> to vector<1x32xi32>
    %88 = arith.sitofp %87 : vector<1x32xi32> to vector<1x32xf32>
    %89 = vector.broadcast %88 : vector<1x32xf32> to vector<24x32xf32>
    %90 = arith.mulf %32, %89 : vector<24x32xf32>
    %91 = vector.broadcast %88 : vector<1x32xf32> to vector<24x32xf32>
    %92 = arith.mulf %46, %91 : vector<24x32xf32>
    %cst_37 = arith.constant dense<0.000000e+00> : vector<24x24xf32>
    %93 = tpu.matmul %90, %39, %cst_37 {dimension_numbers = #tpu.dot_dimension_numbers<[1], [1], [0], [0], [0, 0, 1, 0], [], []>} : vector<24x32xf32>, vector<24x32xf32>, vector<24x24xf32> -> vector<24x24xf32>
    %cst_38 = arith.constant 0.353553385 : f32
    %94 = vector.broadcast %cst_38 : f32 to vector<24x24xf32>
    %95 = arith.mulf %93, %94 : vector<24x24xf32>
    %cst_39 = arith.constant -1.000000e+30 : f32
    %96 = vector.shape_cast %50 : vector<1x24xi1> to vector<1x24xi1>
    %97 = vector.broadcast %96 : vector<1x24xi1> to vector<24x24xi1>
    %98 = vector.broadcast %cst_39 : f32 to vector<24x24xf32>
    %99 = arith.select %97, %95, %98 : vector<24x24xi1>, vector<24x24xf32>
    %cst_40 = arith.constant dense<0xFF800000> : vector<24xf32>
    %100 = vector.multi_reduction <maximumf>, %99, %cst_40 [1] : vector<24x24xf32> to vector<24xf32>
    %101 = vector.shape_cast %100 : vector<24xf32> to vector<24x1xf32>
    %102 = vector.broadcast %101 : vector<24x1xf32> to vector<24x24xf32>
    %103 = arith.subf %99, %102 : vector<24x24xf32>
    %104 = math.exp %103 : vector<24x24xf32>
    %cst_41 = arith.constant dense<0.000000e+00> : vector<24xf32>
    %105 = vector.multi_reduction <add>, %104, %cst_41 [1] : vector<24x24xf32> to vector<24xf32>
    %106 = vector.shape_cast %105 : vector<24xf32> to vector<24x1xf32>
    %107 = tpu.reciprocal %106 {approx = true} : vector<24x1xf32> -> vector<24x1xf32>
    %108 = vector.broadcast %107 : vector<24x1xf32> to vector<24x24xf32>
    %109 = arith.mulf %104, %108 : vector<24x24xf32>
    %cst_42 = arith.constant dense<0.000000e+00> : vector<24x32xf32>
    %110 = tpu.matmul %109, %92, %cst_42 {dimension_numbers = #tpu.dot_dimension_numbers<[1], [0], [0], [1], [0, 0, 1, 1], [], []>} : vector<24x24xf32>, vector<24x32xf32>, vector<24x32xf32> -> vector<24x32xf32>
    %111 = arith.addf %81, %110 : vector<24x32xf32>
    %c16_i32_43 = arith.constant 16 : i32
    %112 = vector.broadcast %c16_i32_43 : i32 to vector<1x32xi32>
    %113 = arith.cmpi sge, %47, %112 : vector<1x32xi32>
    %c24_i32 = arith.constant 24 : i32
    %114 = vector.broadcast %c24_i32 : i32 to vector<1x32xi32>
    %115 = arith.cmpi slt, %47, %114 : vector<1x32xi32>
    %116 = arith.andi %113, %115 : vector<1x32xi1>
    %117 = arith.extui %116 : vector<1x32xi1> to vector<1x32xi32>
    %118 = arith.sitofp %117 : vector<1x32xi32> to vector<1x32xf32>
    %119 = vector.broadcast %118 : vector<1x32xf32> to vector<24x32xf32>
    %120 = arith.mulf %32, %119 : vector<24x32xf32>
    %121 = vector.broadcast %118 : vector<1x32xf32> to vector<24x32xf32>
    %122 = arith.mulf %46, %121 : vector<24x32xf32>
    %cst_44 = arith.constant dense<0.000000e+00> : vector<24x24xf32>
    %123 = tpu.matmul %120, %39, %cst_44 {dimension_numbers = #tpu.dot_dimension_numbers<[1], [1], [0], [0], [0, 0, 1, 0], [], []>} : vector<24x32xf32>, vector<24x32xf32>, vector<24x24xf32> -> vector<24x24xf32>
    %cst_45 = arith.constant 0.353553385 : f32
    %124 = vector.broadcast %cst_45 : f32 to vector<24x24xf32>
    %125 = arith.mulf %123, %124 : vector<24x24xf32>
    %cst_46 = arith.constant -1.000000e+30 : f32
    %126 = vector.shape_cast %50 : vector<1x24xi1> to vector<1x24xi1>
    %127 = vector.broadcast %126 : vector<1x24xi1> to vector<24x24xi1>
    %128 = vector.broadcast %cst_46 : f32 to vector<24x24xf32>
    %129 = arith.select %127, %125, %128 : vector<24x24xi1>, vector<24x24xf32>
    %cst_47 = arith.constant dense<0xFF800000> : vector<24xf32>
    %130 = vector.multi_reduction <maximumf>, %129, %cst_47 [1] : vector<24x24xf32> to vector<24xf32>
    %131 = vector.shape_cast %130 : vector<24xf32> to vector<24x1xf32>
    %132 = vector.broadcast %131 : vector<24x1xf32> to vector<24x24xf32>
    %133 = arith.subf %129, %132 : vector<24x24xf32>
    %134 = math.exp %133 : vector<24x24xf32>
    %cst_48 = arith.constant dense<0.000000e+00> : vector<24xf32>
    %135 = vector.multi_reduction <add>, %134, %cst_48 [1] : vector<24x24xf32> to vector<24xf32>
    %136 = vector.shape_cast %135 : vector<24xf32> to vector<24x1xf32>
    %137 = tpu.reciprocal %136 {approx = true} : vector<24x1xf32> -> vector<24x1xf32>
    %138 = vector.broadcast %137 : vector<24x1xf32> to vector<24x24xf32>
    %139 = arith.mulf %134, %138 : vector<24x24xf32>
    %cst_49 = arith.constant dense<0.000000e+00> : vector<24x32xf32>
    %140 = tpu.matmul %139, %122, %cst_49 {dimension_numbers = #tpu.dot_dimension_numbers<[1], [0], [0], [1], [0, 0, 1, 1], [], []>} : vector<24x24xf32>, vector<24x32xf32>, vector<24x32xf32> -> vector<24x32xf32>
    %141 = arith.addf %111, %140 : vector<24x32xf32>
    %c24_i32_50 = arith.constant 24 : i32
    %142 = vector.broadcast %c24_i32_50 : i32 to vector<1x32xi32>
    %143 = arith.cmpi sge, %47, %142 : vector<1x32xi32>
    %c32_i32 = arith.constant 32 : i32
    %144 = vector.broadcast %c32_i32 : i32 to vector<1x32xi32>
    %145 = arith.cmpi slt, %47, %144 : vector<1x32xi32>
    %146 = arith.andi %143, %145 : vector<1x32xi1>
    %147 = arith.extui %146 : vector<1x32xi1> to vector<1x32xi32>
    %148 = arith.sitofp %147 : vector<1x32xi32> to vector<1x32xf32>
    %149 = vector.broadcast %148 : vector<1x32xf32> to vector<24x32xf32>
    %150 = arith.mulf %32, %149 : vector<24x32xf32>
    %151 = vector.broadcast %148 : vector<1x32xf32> to vector<24x32xf32>
    %152 = arith.mulf %46, %151 : vector<24x32xf32>
    %cst_51 = arith.constant dense<0.000000e+00> : vector<24x24xf32>
    %153 = tpu.matmul %150, %39, %cst_51 {dimension_numbers = #tpu.dot_dimension_numbers<[1], [1], [0], [0], [0, 0, 1, 0], [], []>} : vector<24x32xf32>, vector<24x32xf32>, vector<24x24xf32> -> vector<24x24xf32>
    %cst_52 = arith.constant 0.353553385 : f32
    %154 = vector.broadcast %cst_52 : f32 to vector<24x24xf32>
    %155 = arith.mulf %153, %154 : vector<24x24xf32>
    %cst_53 = arith.constant -1.000000e+30 : f32
    %156 = vector.shape_cast %50 : vector<1x24xi1> to vector<1x24xi1>
    %157 = vector.broadcast %156 : vector<1x24xi1> to vector<24x24xi1>
    %158 = vector.broadcast %cst_53 : f32 to vector<24x24xf32>
    %159 = arith.select %157, %155, %158 : vector<24x24xi1>, vector<24x24xf32>
    %cst_54 = arith.constant dense<0xFF800000> : vector<24xf32>
    %160 = vector.multi_reduction <maximumf>, %159, %cst_54 [1] : vector<24x24xf32> to vector<24xf32>
    %161 = vector.shape_cast %160 : vector<24xf32> to vector<24x1xf32>
    %162 = vector.broadcast %161 : vector<24x1xf32> to vector<24x24xf32>
    %163 = arith.subf %159, %162 : vector<24x24xf32>
    %164 = math.exp %163 : vector<24x24xf32>
    %cst_55 = arith.constant dense<0.000000e+00> : vector<24xf32>
    %165 = vector.multi_reduction <add>, %164, %cst_55 [1] : vector<24x24xf32> to vector<24xf32>
    %166 = vector.shape_cast %165 : vector<24xf32> to vector<24x1xf32>
    %167 = tpu.reciprocal %166 {approx = true} : vector<24x1xf32> -> vector<24x1xf32>
    %168 = vector.broadcast %167 : vector<24x1xf32> to vector<24x24xf32>
    %169 = arith.mulf %164, %168 : vector<24x24xf32>
    %cst_56 = arith.constant dense<0.000000e+00> : vector<24x32xf32>
    %170 = tpu.matmul %169, %152, %cst_56 {dimension_numbers = #tpu.dot_dimension_numbers<[1], [0], [0], [1], [0, 0, 1, 1], [], []>} : vector<24x24xf32>, vector<24x32xf32>, vector<24x32xf32> -> vector<24x32xf32>
    %171 = arith.addf %141, %170 : vector<24x32xf32>
    %c0_57 = arith.constant 0 : index
    %c0_58 = arith.constant 0 : index
    %172 = vector.load %arg6[%c0_57, %c0_58] : memref<32x32xf32, #tpu.memory_space<vmem>>, vector<32x32xf32>
    %cst_59 = arith.constant dense<0.000000e+00> : vector<24x32xf32>
    %173 = tpu.matmul %171, %172, %cst_59 {dimension_numbers = #tpu.dot_dimension_numbers<[1], [0], [0], [1], [0, 0, 1, 1], [], []>} : vector<24x32xf32>, vector<32x32xf32>, vector<24x32xf32> -> vector<24x32xf32>
    %c0_60 = arith.constant 0 : index
    %c0_61 = arith.constant 0 : index
    %174 = vector.load %arg7[%c0_60, %c0_61] : memref<1x32xf32, #tpu.memory_space<vmem>>, vector<1x32xf32>
    %175 = vector.broadcast %174 : vector<1x32xf32> to vector<24x32xf32>
    %176 = arith.addf %173, %175 : vector<24x32xf32>
    %177 = arith.addf %1, %176 : vector<24x32xf32>
    %c0_62 = arith.constant 0 : index
    %c0_63 = arith.constant 0 : index
    %178 = vector.load %arg8[%c0_62, %c0_63] : memref<1x32xf32, #tpu.memory_space<vmem>>, vector<1x32xf32>
    %c0_64 = arith.constant 0 : index
    %c0_65 = arith.constant 0 : index
    %179 = vector.load %arg9[%c0_64, %c0_65] : memref<1x32xf32, #tpu.memory_space<vmem>>, vector<1x32xf32>
    %cst_66 = arith.constant dense<0.000000e+00> : vector<24xf32>
    %180 = vector.multi_reduction <add>, %177, %cst_66 [1] : vector<24x32xf32> to vector<24xf32>
    %181 = vector.shape_cast %180 : vector<24xf32> to vector<24x1xf32>
    %cst_67 = arith.constant 3.200000e+01 : f32
    %182 = vector.broadcast %cst_67 : f32 to vector<24x1xf32>
    %183 = arith.divf %181, %182 : vector<24x1xf32>
    %184 = vector.broadcast %183 : vector<24x1xf32> to vector<24x32xf32>
    %185 = arith.subf %177, %184 : vector<24x32xf32>
    %186 = arith.mulf %185, %185 : vector<24x32xf32>
    %cst_68 = arith.constant dense<0.000000e+00> : vector<24xf32>
    %187 = vector.multi_reduction <add>, %186, %cst_68 [1] : vector<24x32xf32> to vector<24xf32>
    %188 = vector.shape_cast %187 : vector<24xf32> to vector<24x1xf32>
    %cst_69 = arith.constant 3.200000e+01 : f32
    %189 = vector.broadcast %cst_69 : f32 to vector<24x1xf32>
    %190 = arith.divf %188, %189 : vector<24x1xf32>
    %191 = vector.broadcast %183 : vector<24x1xf32> to vector<24x32xf32>
    %192 = arith.subf %177, %191 : vector<24x32xf32>
    %cst_70 = arith.constant 9.99999974E-6 : f32
    %193 = vector.broadcast %cst_70 : f32 to vector<24x1xf32>
    %194 = arith.addf %190, %193 : vector<24x1xf32>
    %195 = math.rsqrt %194 : vector<24x1xf32>
    %196 = vector.broadcast %195 : vector<24x1xf32> to vector<24x32xf32>
    %197 = arith.mulf %192, %196 : vector<24x32xf32>
    %198 = vector.broadcast %178 : vector<1x32xf32> to vector<24x32xf32>
    %199 = arith.mulf %197, %198 : vector<24x32xf32>
    %200 = vector.broadcast %179 : vector<1x32xf32> to vector<24x32xf32>
    %201 = arith.addf %199, %200 : vector<24x32xf32>
    %c0_71 = arith.constant 0 : index
    %c0_72 = arith.constant 0 : index
    %202 = vector.load %arg10[%c0_71, %c0_72] : memref<32x64xf32, #tpu.memory_space<vmem>>, vector<32x64xf32>
    %cst_73 = arith.constant dense<0.000000e+00> : vector<24x64xf32>
    %203 = tpu.matmul %201, %202, %cst_73 {dimension_numbers = #tpu.dot_dimension_numbers<[1], [0], [0], [1], [0, 0, 1, 1], [], []>} : vector<24x32xf32>, vector<32x64xf32>, vector<24x64xf32> -> vector<24x64xf32>
    %c0_74 = arith.constant 0 : index
    %c0_75 = arith.constant 0 : index
    %204 = vector.load %arg11[%c0_74, %c0_75] : memref<1x64xf32, #tpu.memory_space<vmem>>, vector<1x64xf32>
    %205 = vector.broadcast %204 : vector<1x64xf32> to vector<24x64xf32>
    %206 = arith.addf %203, %205 : vector<24x64xf32>
    %207 = arith.mulf %206, %206 : vector<24x64xf32>
    %208 = arith.mulf %206, %207 : vector<24x64xf32>
    %cst_76 = arith.constant 4.471500e-02 : f32
    %209 = vector.broadcast %cst_76 : f32 to vector<24x64xf32>
    %210 = arith.mulf %209, %208 : vector<24x64xf32>
    %211 = arith.addf %206, %210 : vector<24x64xf32>
    %cst_77 = arith.constant 0.797884583 : f32
    %212 = vector.broadcast %cst_77 : f32 to vector<24x64xf32>
    %213 = arith.mulf %212, %211 : vector<24x64xf32>
    %214 = math.tanh %213 : vector<24x64xf32>
    %cst_78 = arith.constant 1.000000e+00 : f32
    %215 = vector.broadcast %cst_78 : f32 to vector<24x64xf32>
    %216 = arith.addf %215, %214 : vector<24x64xf32>
    %cst_79 = arith.constant 5.000000e-01 : f32
    %217 = vector.broadcast %cst_79 : f32 to vector<24x64xf32>
    %218 = arith.mulf %217, %216 : vector<24x64xf32>
    %219 = arith.mulf %206, %218 : vector<24x64xf32>
    %c0_80 = arith.constant 0 : index
    %c0_81 = arith.constant 0 : index
    %220 = vector.load %arg12[%c0_80, %c0_81] : memref<64x32xf32, #tpu.memory_space<vmem>>, vector<64x32xf32>
    %cst_82 = arith.constant dense<0.000000e+00> : vector<24x32xf32>
    %221 = tpu.matmul %219, %220, %cst_82 {dimension_numbers = #tpu.dot_dimension_numbers<[1], [0], [0], [1], [0, 0, 1, 1], [], []>} : vector<24x64xf32>, vector<64x32xf32>, vector<24x32xf32> -> vector<24x32xf32>
    %c0_83 = arith.constant 0 : index
    %c0_84 = arith.constant 0 : index
    %222 = vector.load %arg13[%c0_83, %c0_84] : memref<1x32xf32, #tpu.memory_space<vmem>>, vector<1x32xf32>
    %223 = vector.broadcast %222 : vector<1x32xf32> to vector<24x32xf32>
    %224 = arith.addf %221, %223 : vector<24x32xf32>
    %225 = arith.addf %177, %224 : vector<24x32xf32>
    %c0_85 = arith.constant 0 : index
    %c0_86 = arith.constant 0 : index
    %c0_87 = arith.constant 0 : index
    %226 = vector.load %arg14[%c0_85, %c0_86, %c0_87] : memref<1x24x32xf32, #tpu.memory_space<vmem>>, vector<1x24x32xf32>
    %227 = vector.shape_cast %226 : vector<1x24x32xf32> to vector<24x32xf32>
    %228 = vector.shape_cast %225 : vector<24x32xf32> to vector<1x24x32xf32>
    tpu.vector_store %arg14[%c0_85, %c0_86, %c0_87], %228 {strides = array<i32>} : memref<1x24x32xf32, #tpu.memory_space<vmem>>, vector<1x24x32xf32>,
    return
  }
  func.func @transform_0(%arg0: i32) -> (i32, i32, i32) {
    %c0_i32 = arith.constant 0 : i32
    %c0_i32_0 = arith.constant 0 : i32
    %c0_i32_1 = arith.constant 0 : i32
    return %arg0, %c0_i32, %c0_i32_0 : i32, i32, i32
  }
  func.func @transform_1(%arg0: i32) -> (i32, i32) {
    %c0_i32 = arith.constant 0 : i32
    %c0_i32_0 = arith.constant 0 : i32
    %c0_i32_1 = arith.constant 0 : i32
    return %c0_i32, %c0_i32_0 : i32, i32
  }
  func.func @transform_2(%arg0: i32) -> (i32, i32) {
    %c0_i32 = arith.constant 0 : i32
    %c0_i32_0 = arith.constant 0 : i32
    %c0_i32_1 = arith.constant 0 : i32
    return %c0_i32, %c0_i32_0 : i32, i32
  }
  func.func @transform_3(%arg0: i32) -> (i32, i32, i32) {
    %c0_i32 = arith.constant 0 : i32
    %c0_i32_0 = arith.constant 0 : i32
    %c0_i32_1 = arith.constant 0 : i32
    %c0_i32_2 = arith.constant 0 : i32
    return %c0_i32, %c0_i32_0, %c0_i32_1 : i32, i32, i32
  }
  func.func @transform_4(%arg0: i32) -> (i32, i32, i32) {
    %c0_i32 = arith.constant 0 : i32
    %c0_i32_0 = arith.constant 0 : i32
    %c0_i32_1 = arith.constant 0 : i32
    %c0_i32_2 = arith.constant 0 : i32
    return %c0_i32, %c0_i32_0, %c0_i32_1 : i32, i32, i32
  }
  func.func @transform_5(%arg0: i32) -> (i32, i32) {
    %c0_i32 = arith.constant 0 : i32
    %c0_i32_0 = arith.constant 0 : i32
    %c0_i32_1 = arith.constant 0 : i32
    return %c0_i32, %c0_i32_0 : i32, i32
  }
  func.func @transform_6(%arg0: i32) -> (i32, i32) {
    %c0_i32 = arith.constant 0 : i32
    %c0_i32_0 = arith.constant 0 : i32
    %c0_i32_1 = arith.constant 0 : i32
    return %c0_i32, %c0_i32_0 : i32, i32
  }
  func.func @transform_7(%arg0: i32) -> (i32, i32) {
    %c0_i32 = arith.constant 0 : i32
    %c0_i32_0 = arith.constant 0 : i32
    %c0_i32_1 = arith.constant 0 : i32
    return %c0_i32, %c0_i32_0 : i32, i32
  }
  func.func @transform_8(%arg0: i32) -> (i32, i32) {
    %c0_i32 = arith.constant 0 : i32
    %c0_i32_0 = arith.constant 0 : i32
    %c0_i32_1 = arith.constant 0 : i32
    return %c0_i32, %c0_i32_0 : i32, i32
  }
  func.func @transform_9(%arg0: i32) -> (i32, i32) {
    %c0_i32 = arith.constant 0 : i32
    %c0_i32_0 = arith.constant 0 : i32
    %c0_i32_1 = arith.constant 0 : i32
    return %c0_i32, %c0_i32_0 : i32, i32
  }
  func.func @transform_10(%arg0: i32) -> (i32, i32) {
    %c0_i32 = arith.constant 0 : i32
    %c0_i32_0 = arith.constant 0 : i32
    %c0_i32_1 = arith.constant 0 : i32
    return %c0_i32, %c0_i32_0 : i32, i32
  }
  func.func @transform_11(%arg0: i32) -> (i32, i32) {
    %c0_i32 = arith.constant 0 : i32
    %c0_i32_0 = arith.constant 0 : i32
    %c0_i32_1 = arith.constant 0 : i32
    return %c0_i32, %c0_i32_0 : i32, i32
  }
  func.func @transform_12(%arg0: i32) -> (i32, i32) {
    %c0_i32 = arith.constant 0 : i32
    %c0_i32_0 = arith.constant 0 : i32
    %c0_i32_1 = arith.constant 0 : i32
    return %c0_i32, %c0_i32_0 : i32, i32
  }
  func.func @transform_13(%arg0: i32) -> (i32, i32, i32) {
    %c0_i32 = arith.constant 0 : i32
    %c0_i32_0 = arith.constant 0 : i32
    %c0_i32_1 = arith.constant 0 : i32
    return %arg0, %c0_i32, %c0_i32_0 : i32, i32, i32
  }
}

module attributes {stable_mosaic.version = 11 : i64} {
  func.func @_head_kernel(%arg0: i32, %arg1: memref<2x32xf32, #tpu.memory_space<vmem>>, %arg2: memref<1x32xf32, #tpu.memory_space<vmem>>, %arg3: memref<1x32xf32, #tpu.memory_space<vmem>>, %arg4: memref<32x10xf32, #tpu.memory_space<vmem>>, %arg5: memref<1x10xf32, #tpu.memory_space<vmem>>, %arg6: memref<2x10xf32, #tpu.memory_space<vmem>>) attributes {dimension_semantics = [#tpu.dimension_semantics<arbitrary>], iteration_bounds = array<i64: 1>, scalar_prefetch = 0 : i64, scratch_operands = 0 : i64, tpu.core_type = #tpu.core_type<tc>, window_params = [{pipeline_mode = #tpu.pipeline_mode<synchronous>, transform_indices = @transform_0, window_bounds = array<i64: 2, 32>}, {pipeline_mode = #tpu.pipeline_mode<synchronous>, transform_indices = @transform_1, window_bounds = array<i64: 1, 32>}, {pipeline_mode = #tpu.pipeline_mode<synchronous>, transform_indices = @transform_2, window_bounds = array<i64: 1, 32>}, {pipeline_mode = #tpu.pipeline_mode<synchronous>, transform_indices = @transform_3, window_bounds = array<i64: 32, 10>}, {pipeline_mode = #tpu.pipeline_mode<synchronous>, transform_indices = @transform_4, window_bounds = array<i64: 1, 10>}, {pipeline_mode = #tpu.pipeline_mode<synchronous>, transform_indices = @transform_5, window_bounds = array<i64: 2, 10>}]} {
    %c0 = arith.constant 0 : index
    %c0_0 = arith.constant 0 : index
    %0 = vector.load %arg1[%c0, %c0_0] : memref<2x32xf32, #tpu.memory_space<vmem>>, vector<2x32xf32>
    %c0_1 = arith.constant 0 : index
    %c0_2 = arith.constant 0 : index
    %1 = vector.load %arg2[%c0_1, %c0_2] : memref<1x32xf32, #tpu.memory_space<vmem>>, vector<1x32xf32>
    %c0_3 = arith.constant 0 : index
    %c0_4 = arith.constant 0 : index
    %2 = vector.load %arg3[%c0_3, %c0_4] : memref<1x32xf32, #tpu.memory_space<vmem>>, vector<1x32xf32>
    %cst = arith.constant dense<0.000000e+00> : vector<2xf32>
    %3 = vector.multi_reduction <add>, %0, %cst [1] : vector<2x32xf32> to vector<2xf32>
    %4 = vector.shape_cast %3 : vector<2xf32> to vector<2x1xf32>
    %cst_5 = arith.constant 3.200000e+01 : f32
    %5 = vector.broadcast %cst_5 : f32 to vector<2x1xf32>
    %6 = arith.divf %4, %5 : vector<2x1xf32>
    %7 = vector.broadcast %6 : vector<2x1xf32> to vector<2x32xf32>
    %8 = arith.subf %0, %7 : vector<2x32xf32>
    %9 = arith.mulf %8, %8 : vector<2x32xf32>
    %cst_6 = arith.constant dense<0.000000e+00> : vector<2xf32>
    %10 = vector.multi_reduction <add>, %9, %cst_6 [1] : vector<2x32xf32> to vector<2xf32>
    %11 = vector.shape_cast %10 : vector<2xf32> to vector<2x1xf32>
    %cst_7 = arith.constant 3.200000e+01 : f32
    %12 = vector.broadcast %cst_7 : f32 to vector<2x1xf32>
    %13 = arith.divf %11, %12 : vector<2x1xf32>
    %14 = vector.broadcast %6 : vector<2x1xf32> to vector<2x32xf32>
    %15 = arith.subf %0, %14 : vector<2x32xf32>
    %cst_8 = arith.constant 9.99999974E-6 : f32
    %16 = vector.broadcast %cst_8 : f32 to vector<2x1xf32>
    %17 = arith.addf %13, %16 : vector<2x1xf32>
    %18 = math.rsqrt %17 : vector<2x1xf32>
    %19 = vector.broadcast %18 : vector<2x1xf32> to vector<2x32xf32>
    %20 = arith.mulf %15, %19 : vector<2x32xf32>
    %21 = vector.broadcast %1 : vector<1x32xf32> to vector<2x32xf32>
    %22 = arith.mulf %20, %21 : vector<2x32xf32>
    %23 = vector.broadcast %2 : vector<1x32xf32> to vector<2x32xf32>
    %24 = arith.addf %22, %23 : vector<2x32xf32>
    %c0_9 = arith.constant 0 : index
    %c0_10 = arith.constant 0 : index
    %25 = vector.load %arg4[%c0_9, %c0_10] : memref<32x10xf32, #tpu.memory_space<vmem>>, vector<32x10xf32>
    %cst_11 = arith.constant dense<0.000000e+00> : vector<2x10xf32>
    %26 = tpu.matmul %24, %25, %cst_11 {dimension_numbers = #tpu.dot_dimension_numbers<[1], [0], [0], [1], [0, 0, 1, 1], [], []>} : vector<2x32xf32>, vector<32x10xf32>, vector<2x10xf32> -> vector<2x10xf32>
    %c0_12 = arith.constant 0 : index
    %c0_13 = arith.constant 0 : index
    %27 = vector.load %arg5[%c0_12, %c0_13] : memref<1x10xf32, #tpu.memory_space<vmem>>, vector<1x10xf32>
    %28 = vector.broadcast %27 : vector<1x10xf32> to vector<2x10xf32>
    %29 = arith.addf %26, %28 : vector<2x10xf32>
    %c0_14 = arith.constant 0 : index
    %c0_15 = arith.constant 0 : index
    %30 = vector.load %arg6[%c0_14, %c0_15] : memref<2x10xf32, #tpu.memory_space<vmem>>, vector<2x10xf32>
    tpu.vector_store %arg6[%c0_14, %c0_15], %29 {strides = array<i32>} : memref<2x10xf32, #tpu.memory_space<vmem>>, vector<2x10xf32>,
    return
  }
  func.func @transform_0(%arg0: i32) -> (i32, i32) {
    %c0_i32 = arith.constant 0 : i32
    %c0_i32_0 = arith.constant 0 : i32
    %c0_i32_1 = arith.constant 0 : i32
    return %c0_i32, %c0_i32_0 : i32, i32
  }
  func.func @transform_1(%arg0: i32) -> (i32, i32) {
    %c0_i32 = arith.constant 0 : i32
    %c0_i32_0 = arith.constant 0 : i32
    %c0_i32_1 = arith.constant 0 : i32
    return %c0_i32, %c0_i32_0 : i32, i32
  }
  func.func @transform_2(%arg0: i32) -> (i32, i32) {
    %c0_i32 = arith.constant 0 : i32
    %c0_i32_0 = arith.constant 0 : i32
    %c0_i32_1 = arith.constant 0 : i32
    return %c0_i32, %c0_i32_0 : i32, i32
  }
  func.func @transform_3(%arg0: i32) -> (i32, i32) {
    %c0_i32 = arith.constant 0 : i32
    %c0_i32_0 = arith.constant 0 : i32
    %c0_i32_1 = arith.constant 0 : i32
    return %c0_i32, %c0_i32_0 : i32, i32
  }
  func.func @transform_4(%arg0: i32) -> (i32, i32) {
    %c0_i32 = arith.constant 0 : i32
    %c0_i32_0 = arith.constant 0 : i32
    %c0_i32_1 = arith.constant 0 : i32
    return %c0_i32, %c0_i32_0 : i32, i32
  }
  func.func @transform_5(%arg0: i32) -> (i32, i32) {
    %c0_i32 = arith.constant 0 : i32
    %c0_i32_0 = arith.constant 0 : i32
    %c0_i32_1 = arith.constant 0 : i32
    return %c0_i32, %c0_i32_0 : i32, i32
  }
}

</mosaic_0001>

<bundles_post_ra>
// kernel: vit_forward.7
= control target key start
LH: loop header
LB: loop body
LE: loop exit
PB: predicated region body
PF: predicated region fallthrough
CT: control target
= control target key end

     0   :  { %vm24_vm0 = vcmask 254976   ;;  %s261_s0 = inlined_call_operand.vmem [shape: f32[2,32], index: 0, kind: input, shape index: {}]   ;;  %s262_s1 = inlined_call_operand.vmem [shape: f32[1,32], index: 1, kind: input, shape index: {}]   ;;  %s263_s2 = inlined_call_operand.vmem [shape: f32[1,32], index: 2, kind: input, shape index: {}]   ;;  %s264_s3 = inlined_call_operand.vmem [shape: f32[32,10], index: 3, kind: input, shape index: {}]   ;;  %s265_s4 = inlined_call_operand.vmem [shape: f32[1,10], index: 4, kind: input, shape index: {}]   ;;  %s266_s5 = inlined_call_operand.hbm [shape: f32[2,10], index: 5, kind: output, shape index: {}]  }
   0x1   :  { %v21_v0 = vld [vmem:[%s261_s0] sm:$0x3] }
   0x2   :  { %10 = vsyncpa [#allocation3], 0  ;;  %v25_v1 = vsel %vm24_vm0, %v21_v0, 0.0  ;;  %v56_v7 = vld [vmem:[%s264_s3 + $0x18] sm:$0xff]  ;;  %v201_v8 = vmov 0.0   ;;  %v55_v9 = vld [vmem:[%s264_s3 + $0x10] sm:$0xff] }
   0x3   :  { %26 = vadd.xlane.f32.xlu0 %v25_v1  ;;  %163 = vmatprep.subr.mxu0 %v201_v8  ;;  %vm202_vm1 = vmmov 0   ;;  %v54_v10 = vld [vmem:[%s264_s3 + $0x8] sm:$0xff]  ;;  %v53_v11 = vld [vmem:[%s264_s3] sm:$0xff]  ;;  %vm64_vm2 = vcmask 261120   ;;  %s203_s7 = smov [#allocation2]   ;;  %vm138_vm3 = vcmask 74752  }
   0x4   :  { %171 = vmatprep.mubr.msk.f32.mxu0 %vm202_vm1, %v201_v8  ;;  %164 = vmatpush3.msra.mxu0 %v56_v7  ;;  %v154_v16 = vld [vmem:[%s262_s1] ss:$0 sm:$0xff]  ;;  %s146_s8 = sshll.u32 %s203_s7, 4  ;;  %s147_s8 = int_to_ptr.vmem [resolvable:$true] %s146_s8 }
   0x5   :  { %165 = vmatprep.subr.mxu0 %v201_v8  ;;  %v155_v18 = vld [vmem:[%s263_s2] ss:$0 sm:$0xff]  ;;  %s179_s1 = scalar_lea.vmem %s147_s8, 32  ;;  %p184_p1 = scmp.lt.s32.totalorder %s147_s8, %s147_s8 }
   0x6   :  { %166 = vmatpush3.msra.mxu0 %v55_v9  ;;  %v156_v21 = vld [vmem:[%s265_s4] ss:$0 sm:$0xff]  ;;  %p180_p0 = scmp.ne.s32.totalorder %s147_s8, %s179_s1  ;;  %p185_p2 = scmp.lt.s32.totalorder %s179_s1, %s179_s1 }
   0x7   :  { %167 = vmatprep.subr.mxu0 %v201_v8 }
   0x8   :  { %168 = vmatpush3.msra.mxu0 %v54_v10  ;;  %p186_p3 = por %p185_p2, %p184_p1 }
   0x9   :  { %169 = vmatprep.subr.mxu0 %v201_v8 }
   0xa   :  { %170 = vmatpush3.msra.mxu0 %v53_v11  ;;  %p187_p4 = pnand %p186_p3, %p180_p0 }
  0x8c   :  { %v27_v2 = vpop.xlane.xlu0 %26 }
  0x8d   :  { %v29_v3 = vmul.f32 0.03125, %v27_v2 }
  0x8f   :  { %v30_v4 = vsub.f32 %v21_v0, %v29_v3 }
  0x91   :  { %v31_v5 = vmul.f32 %v30_v4, %v30_v4 }
  0x93   :  { %v32_v6 = vsel %vm24_vm0, %v31_v5, 0.0 }
  0x94   :  { %33 = vadd.xlane.f32.xlu0 %v32_v6 }
 0x11d   :  { %v34_v12 = vpop.xlane.xlu0 %33 }
 0x11e   :  { %v35_v13 = vmul.f32 0.03125, %v34_v12 }
 0x120   :  { %v36_v14 = vadd.f32 1e-05, %v35_v13 }
 0x122   :  { %177 = vrsqrt.f32 %v36_v14 }
 0x12f   :  { %v178_v15 = vpop.eup %177 }
 0x130   :  { %v38_v17 = vmul.f32 %v178_v15, %v30_v4 }
 0x132   :  { %v45_v19 = vmul.f32 %v154_v16, %v38_v17 }
 0x134   :  { %v52_v20 = vadd.f32 %v155_v18, %v45_v19 }
 0x136   :  { %172 = vmatmul.mubr.msk.f32.vlgmr.msra.gmra.mxu0 %vm64_vm2, %v52_v20 }
 0x1f6   :  { %v134_v22 = vpop.f32.mrf.mxu0 }
 0x1f7   :  { %v135_v23 = vadd.f32 %v156_v21, %v134_v22 }
 0x1f8   :  { %v173_v24 = vpop.f32.mrf.mxu0 }
 0x1f9   :  { %139 = vst.msk [vmem:[#allocation2] sm:$0x3] %vm138_vm3, %v135_v23 }
 0x1fa   :  { %190 = shalt.err (!%p187_p4)
}
 0x1fb   :  { %149 = dma.vmem_to_hbm [thread:$0]  %s147_s8, 32, %s266_s5, [#allocation3]  }
 0x1fc   :  { %199 = dma.done.wait [#allocation3], 32  }
 0x1fd   :  { %200 = vsyncadd [#allocation3], 4294967264 }
 0x1fe   :  { %153 = vsyncpa [#allocation3], 1 }

// kernel: vit_forward.4
= control target key start
LH: loop header
LB: loop body
LE: loop exit
PB: predicated region body
PF: predicated region fallthrough
CT: control target
= control target key end

     0   :  { %s538_s18 = smov 0   ;;  %s598_s0 = inlined_call_operand.vmem [shape: f32[2,24,48], index: 0, kind: input, shape index: {}]   ;;  %s599_s1 = inlined_call_operand.vmem [shape: f32[48,32], index: 1, kind: input, shape index: {}]   ;;  %s600_s2 = inlined_call_operand.vmem [shape: f32[1,32], index: 2, kind: input, shape index: {}]   ;;  %s601_s3 = inlined_call_operand.vmem [shape: f32[1,32], index: 3, kind: input, shape index: {}]   ;;  %s602_s4 = inlined_call_operand.vmem [shape: f32[24,32], index: 4, kind: input, shape index: {}]   ;;  %s603_s5 = inlined_call_operand.vmem [shape: f32[2,24,32], index: 5, kind: output, shape index: {}]  }
   0x1 LB: > { %s431_s19 = sadd.s32 4294967295, %s504_s18   ;;  %p435_p0 = scmp.ge.s32.totalorder %s504_s18, 1  ;;  %s504_s18 = sphi %s538_s18, %s15_s18  }
   0x2   : > { %p187_p1 = scmp.lt.s32.totalorder %s504_s18, 3 }
   0x4   : > { %p188_p2 = pnand %p435_p0, %p187_p1 }
   0x5   : > { %p215_p3 = scmp.lt.s32.totalorder (!%p188_p2), %s431_s19, 1 }
   0x6   : > { %191 = sbr.rel (%p188_p2) target bundleno = 227 (0xe3), region = 40 }
   0xb   : > { %v233_v0 = vld [vmem:[%s599_s1 + $0x28] sm:$0xff]  ;;  %v506_v1 = vmov 0.0   ;;  %v232_v2 = vld [vmem:[%s599_s1 + $0x20] sm:$0xff]  ;;  %s605_s19 = smov (!%p215_p3, %s431_s19), 1  ;;  %v231_v3 = vld [vmem:[%s599_s1 + $0x18] sm:$0xff]  ;;  %vm241_vm0 = vcmask 392192   ;;  %v331_v10 = vlaneseq }
   0xc   : > { %475 = vmatprep.subr.mxu1 %v506_v1  ;;  %454 = vmatprep.subr.mxu0 %v506_v1  ;;  %s487_s26 = smul.u32 24, %s605_s19  ;;  %v230_v4 = vld [vmem:[%s599_s1 + $0x10] sm:$0xff]  ;;  %v229_v5 = vld [vmem:[%s599_s1 + $0x8] sm:$0xff]  ;;  %v228_v6 = vld [vmem:[%s599_s1] sm:$0xff]  ;;  %vm507_vm1 = vmmov 0   ;;  %vm372_vm2 = vcmask 261120  }
   0xd   : > { %481 = vmatpush3.msra.mxu1 %v233_v0  ;;  %455 = vmatpush3.msra.mxu0 %v233_v0  ;;  %v438_v11 = vld [vmem:[%s600_s2] ss:$0 sm:$0xff]  ;;  %v332_v12 = vshrl.u32 %v331_v10, 7  ;;  %v355_v14 = vld [vmem:[%s602_s4 + $0x8] sm:$0xff]  ;;  %v356_v25 = vld [vmem:[%s602_s4 + $0x10] sm:$0xff] }
   0xe   : > { %476 = vmatprep.subr.mxu1 %v506_v1  ;;  %456 = vmatprep.subr.mxu0 %v506_v1  ;;  %s219_s8 = scalar_lea.vmem %s598_s0, %s487_s26  ;;  %s224_s17 = scalar_lea.vmem %s603_s5, %s487_s26  ;;  %v442_v17 = vld [vmem:[%s601_s3] ss:$0 sm:$0xff] }
   0xf   : > { %482 = vmatpush3.msra.mxu1 %v232_v2  ;;  %457 = vmatpush3.msra.mxu0 %v232_v2  ;;  %v226_v7 = vld [vmem:[%s219_s8 + $0x8] sm:$0xff]  ;;  %v225_v8 = vld [vmem:[%s219_s8] sm:$0xff]  ;;  %v227_v9 = vld [vmem:[%s219_s8 + $0x10] sm:$0xff]  ;;  %vm335_vm3 = vcmp.eq.s32.totalorder %v332_v12, 0  ;;  %v334_v19 = vadd.s32 16, %v332_v12 }
  0x10   : > { %477 = vmatprep.subr.mxu1 %v506_v1  ;;  %458 = vmatprep.subr.mxu0 %v506_v1  ;;  %v354_v22 = vld [vmem:[%s602_s4] sm:$0xff] }
  0x11   : > { %483 = vmatpush3.msra.mxu1 %v231_v3  ;;  %459 = vmatpush3.msra.mxu0 %v231_v3  ;;  %vm362_vm4 = vcmp.lt.s32.totalorder %v334_v19, 17 }
  0x12   : > { %478 = vmatprep.subr.mxu1 %v506_v1  ;;  %460 = vmatprep.subr.mxu0 %v506_v1 }
  0x13   : > { %484 = vmatpush3.msra.mxu1 %v230_v4  ;;  %461 = vmatpush3.msra.mxu0 %v230_v4 }
  0x14   : > { %479 = vmatprep.subr.mxu1 %v506_v1  ;;  %462 = vmatprep.subr.mxu0 %v506_v1 }
  0x15   : > { %485 = vmatpush3.msra.mxu1 %v229_v5  ;;  %463 = vmatpush3.msra.mxu0 %v229_v5 }
  0x16   : > { %480 = vmatprep.subr.mxu1 %v506_v1  ;;  %469 = vmatprep.mubr.msk.f32.mxu1 %vm507_vm1, %v506_v1 }
  0x17   : > { %486 = vmatpush3.msra.mxu1 %v228_v6  ;;  %464 = vmatprep.subr.mxu0 %v506_v1 }
  0x18   : > { %470 = vmatmul.mubr.msk.f32.vlgmr.msra.gmra.mxu1 %vm241_vm0, %v226_v7  ;;  %465 = vmatpush3.msra.mxu0 %v228_v6 }
  0x19   : > { %466 = vmatprep.mubr.msk.f32.mxu0 %vm507_vm1, %v506_v1  ;;  %472 = vmatprep.mubr.msk.f32.mxu1 %vm507_vm1, %v506_v1 }
  0x1a   : > { %467 = vmatmul.mubr.msk.f32.vlgmr.msra.gmra.mxu0 %vm241_vm0, %v225_v8 }
  0x1c   : > { %473 = vmatmul.mubr.msk.f32.gmra.mxu1 %vm241_vm0, %v227_v9 }
  0xd8   : > { %v322_v13 = vpop.f32.mrf.mxu1 }
  0xd9   : > { %v323_v15 = vadd.f32 %v438_v11, %v322_v13 }
  0xda   : > { %v317_v16 = vpop.f32.mrf.mxu0  ;;  %v471_v18 = vpop.f32.mrf.mxu1 }
  0xdb   : > { %v358_v20 = vadd.f32 %v355_v14, %v323_v15  ;;  %v318_v21 = vadd.f32 %v438_v11, %v317_v16 }
  0xdc   : > { %v468_v23 = vpop.f32.mrf.mxu0  ;;  %v327_v24 = vpop.f32.mrf.mxu1 }
  0xdd   : > { %374 = vst.msk [vmem:[%s224_s17 + $0x8] sm:$0xff] %vm372_vm2, %v358_v20  ;;  %v351_v26 = vsel %vm335_vm3, %v442_v17, %v318_v21  ;;  %v328_v27 = vadd.f32 %v438_v11, %v327_v24 }
  0xde   : > { %v357_v28 = vadd.f32 %v354_v22, %v351_v26  ;;  %v474_v29 = vpop.f32.mrf.mxu1 }
  0xdf   : > { %v359_v30 = vadd.f32 %v356_v25, %v328_v27 }
  0xe0   : > { %373 = vst.msk [vmem:[%s224_s17] sm:$0xff] %vm372_vm2, %v357_v28 }
  0xe1   : > { %v371_v31 = vsel %vm362_vm4, %v359_v30, 0.0 }
  0xe2   : > { %375 = vst.msk [vmem:[%s224_s17 + $0x10] sm:$0xff] %vm372_vm2, %v371_v31 }
  0xe3 PF: > { %s15_s18 = sadd.s32 1, %s504_s18  }
  0xe4   : > { %p12_p4 = scmp.ge.s32.totalorder %s15_s18, 4  }
  0xe6   :  { %14 = sbr.rel (!%p12_p4) target bundleno = 1 (0x1), region = 70 }

// kernel: vit_forward.5
= control target key start
LH: loop header
LB: loop body
LE: loop exit
PB: predicated region body
PF: predicated region fallthrough
CT: control target
= control target key end

     0   :  { %s2750_s25 = smov 0   ;;  %s3279_s0 = inlined_call_operand.vmem [shape: f32[2,24,32], index: 0, kind: input, shape index: {}]   ;;  %s3280_s1 = inlined_call_operand.vmem [shape: f32[1,32], index: 1, kind: input, shape index: {}]   ;;  %s3281_s2 = inlined_call_operand.vmem [shape: f32[1,32], index: 2, kind: input, shape index: {}]   ;;  %s3282_s3 = inlined_call_operand.vmem [shape: f32[3,32,32], index: 3, kind: input, shape index: {}]   ;;  %s3283_s4 = inlined_call_operand.vmem [shape: f32[3,1,32], index: 4, kind: input, shape index: {}]   ;;  %s3284_s5 = inlined_call_operand.vmem [shape: f32[32,32], index: 5, kind: input, shape index: {}]   ;;  %s3285_s6 = inlined_call_operand.vmem [shape: f32[1,32], index: 6, kind: input, shape index: {}]   ;;  %s3286_s7 = inlined_call_operand.vmem [shape: f32[1,32], index: 7, kind: input, shape index: {}]   ;;  %s3287_s8 = inlined_call_operand.vmem [shape: f32[1,32], index: 8, kind: input, shape index: {}]   ;;  %s3288_s9 = inlined_call_operand.vmem [shape: f32[32,64], index: 9, kind: input, shape index: {}]   ;;  %s3289_s10 = inlined_call_operand.vmem [shape: f32[1,64], index: 10, kind: input, shape index: {}]   ;;  %s3290_s11 = inlined_call_operand.vmem [shape: f32[64,32], index: 11, kind: input, shape index: {}]   ;;  %s3291_s12 = inlined_call_operand.vmem [shape: f32[1,32], index: 12, kind: input, shape index: {}]   ;;  %s3292_s13 = inlined_call_operand.vmem [shape: f32[2,24,32], index: 13, kind: output, shape index: {}]  }
   0x1 LB: > { %s2179_s26 = sadd.s32 4294967295, %s2676_s25   ;;  %p2183_p0 = scmp.ge.s32.totalorder %s2676_s25, 1  ;;  %s2676_s25 = sphi %s2750_s25, %s23_s25  }
   0x2   : > { %p387_p1 = scmp.lt.s32.totalorder %s2676_s25, 3 }
   0x4   : > { %p388_p2 = pnand %p2183_p0, %p387_p1 }
   0x5   : > { %p431_p3 = scmp.lt.s32.totalorder (!%p388_p2), %s2179_s26, 1 }
   0x6   : > { %391 = sbr.rel (%p388_p2) target bundleno = 2712 (0xa98), region = 72 }
   0xb   : > { %s3294_s26 = smov (!%p431_p3, %s2179_s26), 1  ;;  %vm446_vm0 = vcmask 261120   ;;  %v508_v21 = vld [vmem:[%s3282_s3 + $0x18] sm:$0xff]  ;;  %v2678_v23 = vmov 0.0   ;;  %v507_v24 = vld [vmem:[%s3282_s3 + $0x10] sm:$0xff]  ;;  %v506_v26 = vld [vmem:[%s3282_s3 + $0x8] sm:$0xff]  ;;  %v791_v59 = vlaneseq }
   0xc   : > { %s2590_s27 = smul.u32 24, %s3294_s26  ;;  %v2195_v22 = vld [vmem:[%s3282_s3 + $0x38] sm:$0xff]  ;;  %2360 = vmatprep.subr.mxu0 %v2678_v23  ;;  %2377 = vmatprep.subr.mxu1 %v2678_v23  ;;  %v2194_v25 = vld [vmem:[%s3282_s3 + $0x30] sm:$0xff]  ;;  %v2193_v27 = vld [vmem:[%s3282_s3 + $0x28] sm:$0xff]  ;;  %vm2679_vm1 = vmmov 0   ;;  %vm911_vm13 = vcmask 195584  }
   0xd   : > { %2361 = vmatpush3.msra.mxu0 %v508_v21  ;;  %2378 = vmatpush3.msra.mxu1 %v2195_v22  ;;  %v505_v28 = vld [vmem:[%s3282_s3] sm:$0xff]  ;;  %v2204_v48 = vld [vmem:[%s3282_s3 + $0x58] sm:$0xff]  ;;  %v2203_v51 = vld [vmem:[%s3282_s3 + $0x50] sm:$0xff]  ;;  %v2869_v62 = vand.u32 127, %v791_v59  ;;  %vm2028_vm14 = vcmask 523264  }
   0xe   : > { %s2766_s30 = scalar_lea.vmem %s3279_s0, %s2590_s27  ;;  %2362 = vmatprep.subr.mxu0 %v2678_v23  ;;  %2379 = vmatprep.subr.mxu1 %v2678_v23  ;;  %v2192_v29 = vld [vmem:[%s3282_s3 + $0x20] sm:$0xff]  ;;  %v2202_v54 = vld [vmem:[%s3282_s3 + $0x48] sm:$0xff]  ;;  %s440_s24 = scalar_lea.vmem %s3292_s13, %s2590_s27 }
   0xf   : > { %v441_v0 = vld [vmem:[%s2766_s30] sm:$0xff]  ;;  %v443_v1 = vld [vmem:[%s2766_s30 + $0x10] sm:$0xff]  ;;  %v442_v2 = vld [vmem:[%s2766_s30 + $0x8] sm:$0xff]  ;;  %2363 = vmatpush3.msra.mxu0 %v507_v24  ;;  %2380 = vmatpush3.msra.mxu1 %v2194_v25  ;;  %vm1262_vm2 = vcmp.ge.s32.totalorder %v2869_v62, 16  ;;  %vm1263_vm3 = vcmp.lt.s32.totalorder %v2869_v62, 24  ;;  %vm1493_vm4 = vcmp.ge.s32.totalorder %v2869_v62, 24 }
  0x10   : > { %v447_v3 = vsel %vm446_vm0, %v441_v0, 0.0  ;;  %v453_v4 = vsel %vm446_vm0, %v443_v1, 0.0  ;;  %v450_v5 = vsel %vm446_vm0, %v442_v2, 0.0  ;;  %2364 = vmatprep.subr.mxu0 %v2678_v23  ;;  %2381 = vmatprep.subr.mxu1 %v2678_v23  ;;  %v2186_v40 = vld [vmem:[%s3280_s1] ss:$0 sm:$0xff]  ;;  %vm1494_vm5 = vcmp.lt.s32.totalorder %v2869_v62, 32  ;;  %vm1264_vm8 = vmand %vm1262_vm2, %vm1263_vm3 }
  0x11   : > { %448 = vadd.xlane.f32.xlu0 %v447_v3  ;;  %454 = vadd.xlane.f32.xlu1 %v453_v4  ;;  %v2187_v42 = vld [vmem:[%s3281_s2] ss:$0 sm:$0xff]  ;;  %v2197_v3 = vld [vmem:[%s3283_s4 + $0x1] ss:$0 sm:$0xff]  ;;  %vm945_vm6 = vcmp.ge.s32.totalorder %v2869_v62, 8  ;;  %vm946_vm7 = vcmp.lt.s32.totalorder %v2869_v62, 16  ;;  %vm1495_vm9 = vmand %vm1493_vm4, %vm1494_vm5 }
  0x12   : > { %2365 = vmatpush3.msra.mxu0 %v506_v26  ;;  %2382 = vmatpush3.msra.mxu1 %v2193_v27  ;;  %v2201_v56 = vld [vmem:[%s3282_s3 + $0x40] sm:$0xff]  ;;  %vm795_vm10 = vcmp.lt.s32.totalorder %v2869_v62, 8  ;;  %vm947_vm11 = vmand %vm945_vm6, %vm946_vm7  ;;  %vm793_vm12 = vcmp.lt.s32.totalorder %v2869_v62, 17 }
  0x13   : > { %2366 = vmatprep.subr.mxu0 %v2678_v23  ;;  %2383 = vmatprep.subr.mxu1 %v2678_v23  ;;  %v2217_v22 = vsel %vm947_vm11, 1.0, %v2678_v23 }
  0x14   : > { %2367 = vmatpush3.msra.mxu0 %v505_v28  ;;  %2368 = vmatprep.mubr.msk.f32.mxu0 %vm2679_vm1, %v2678_v23 }
  0x15   : > { %451 = vadd.xlane.f32.xlu0 %v450_v5  ;;  %2384 = vmatpush3.msra.mxu1 %v2192_v29 }
  0x16   : > { %2385 = vmatprep.mubr.msk.f32.mxu1 %vm2679_vm1, %v2678_v23  ;;  %2394 = vmatprep.subr.mxu0 %v2678_v23 }
  0x17   : > { %2411 = vmatprep.subr.mxu1 %v2678_v23 }
  0x9a   : > { %v449_v6 = vpop.xlane.xlu0 %448  ;;  %v455_v7 = vpop.xlane.xlu1 %454 }
  0x9b   : > { %v457_v8 = vmul.f32 0.03125, %v449_v6  ;;  %v459_v9 = vmul.f32 0.03125, %v455_v7 }
  0x9d   : > { %v460_v10 = vsub.f32 %v441_v0, %v457_v8  ;;  %v2774_v11 = vsub.f32 %v443_v1, %v459_v9  ;;  %v2206_v9 = vld [vmem:[%s3283_s4 + $0x2] ss:$0 sm:$0xff] }
  0x9e   : > { %v452_v12 = vpop.xlane.xlu0 %451 }
  0x9f   : > { %v458_v13 = vmul.f32 0.03125, %v452_v12  ;;  %v463_v14 = vmul.f32 %v460_v10, %v460_v10  ;;  %v465_v15 = vmul.f32 %v2774_v11, %v2774_v11 }
  0xa1   : > { %v461_v16 = vsub.f32 %v442_v2, %v458_v13  ;;  %v466_v17 = vsel %vm446_vm0, %v463_v14, 0.0  ;;  %v472_v18 = vsel %vm446_vm0, %v465_v15, 0.0  ;;  %v2898_v14 = vsel %vm1264_vm8, 1.0, %v2678_v23 }
  0xa2   : > { %467 = vadd.xlane.f32.xlu1 %v466_v17  ;;  %v2903_v17 = vsel %vm1495_vm9, 1.0, %v2678_v23 }
  0xa3   : > { %v464_v19 = vmul.f32 %v461_v16, %v461_v16 }
  0xa5   : > { %v469_v20 = vsel %vm446_vm0, %v464_v19, 0.0  ;;  %v2210_v19 = vsel %vm795_vm10, 1.0, %v2678_v23 }
  0xa6   : > { %473 = vadd.xlane.f32.xlu1 %v472_v18  ;;  %470 = vadd.xlane.f32.xlu0 %v469_v20 }
 0x12b   : > { %v468_v30 = vpop.xlane.xlu1 %467 }
 0x12c   : > { %v475_v31 = vmul.f32 0.03125, %v468_v30 }
 0x12e   : > { %v478_v32 = vadd.f32 1e-05, %v475_v31 }
 0x12f   : > { %v474_v33 = vpop.xlane.xlu1 %473  ;;  %v471_v34 = vpop.xlane.xlu0 %470 }
 0x130   : > { %2601 = vrsqrt.f32 %v478_v32  ;;  %v477_v35 = vmul.f32 0.03125, %v474_v33  ;;  %v476_v36 = vmul.f32 0.03125, %v471_v34 }
 0x132   : > { %v480_v37 = vadd.f32 1e-05, %v477_v35  ;;  %v479_v38 = vadd.f32 1e-05, %v476_v36 }
 0x134   : > { %2603 = vrsqrt.f32 %v480_v37 }
 0x135   : > { %2605 = vrsqrt.f32 %v479_v38 }
 0x13d   : > { %v2602_v39 = vpop.eup %2601 }
 0x13e   : > { %v484_v41 = vmul.f32 %v2602_v39, %v460_v10  ;;  %v2188_v10 = vld [vmem:[%s3283_s4] ss:$0 sm:$0xff] }
 0x140   : > { %v493_v43 = vmul.f32 %v2186_v40, %v484_v41 }
 0x141   : > { %v2604_v44 = vpop.eup %2603 }
 0x142   : > { %v2606_v45 = vpop.eup %2605  ;;  %v502_v46 = vadd.f32 %v2187_v42, %v493_v43  ;;  %v486_v49 = vmul.f32 %v2604_v44, %v2774_v11 }
 0x143   : > { %v485_v47 = vmul.f32 %v2606_v45, %v461_v16 }
 0x144   : > { %2369 = vmatmul.mubr.msk.f32.vlgmr.msra.gmra.mxu0 %vm446_vm0, %v502_v46  ;;  %2386 = vmatmul.mubr.msk.f32.vlgmr.msra.gmra.mxu1 %vm446_vm0, %v502_v46  ;;  %v495_v53 = vmul.f32 %v2186_v40, %v486_v49 }
 0x145   : > { %2371 = vmatprep.mubr.msk.f32.mxu0 %vm2679_vm1, %v2678_v23  ;;  %2388 = vmatprep.mubr.msk.f32.mxu1 %vm2679_vm1, %v2678_v23  ;;  %v494_v50 = vmul.f32 %v2186_v40, %v485_v47 }
 0x146   : > { %2395 = vmatpush3.msra.mxu0 %v2204_v48  ;;  %v504_v55 = vadd.f32 %v2187_v42, %v495_v53 }
 0x147   : > { %v503_v52 = vadd.f32 %v2187_v42, %v494_v50  ;;  %2396 = vmatprep.subr.mxu0 %v2678_v23 }
 0x148   : > { %2397 = vmatpush3.msra.mxu0 %v2203_v51 }
 0x149   : > { %2372 = vmatmul.mubr.msk.f32.gmra.mxu0 %vm446_vm0, %v503_v52  ;;  %2389 = vmatmul.mubr.msk.f32.gmra.mxu1 %vm446_vm0, %v503_v52 }
 0x14a   : > { %2374 = vmatprep.mubr.msk.f32.mxu0 %vm2679_vm1, %v2678_v23  ;;  %2391 = vmatprep.mubr.msk.f32.mxu1 %vm2679_vm1, %v2678_v23 }
 0x14b   : > { %2398 = vmatprep.subr.mxu0 %v2678_v23 }
 0x14c   : > { %2399 = vmatpush3.msra.mxu0 %v2202_v54 }
 0x14d   : > { %2375 = vmatmul.mubr.msk.f32.gmra.mxu0 %vm446_vm0, %v504_v55  ;;  %2392 = vmatmul.mubr.msk.f32.gmra.mxu1 %vm446_vm0, %v504_v55 }
 0x14e   : > { %2400 = vmatprep.subr.mxu0 %v2678_v23  ;;  %2402 = vmatprep.mubr.msk.f32.mxu0 %vm2679_vm1, %v2678_v23 }
 0x14f   : > { %2401 = vmatpush3.msra.mxu0 %v2201_v56  ;;  %2417 = vmatprep.mubr.msk.f32.mxu1 %vm2679_vm1, %v2678_v23 }
 0x150   : > { %2426 = vmatprep.subr.mxu0 %v2678_v23 }
 0x151   : > { %2403 = vmatmul.mubr.msk.f32.vlgmr.msra.gmra.mxu0 %vm446_vm0, %v502_v46 }
 0x152   : > { %2405 = vmatprep.mubr.msk.f32.mxu0 %vm2679_vm1, %v2678_v23 }
 0x155   : > { %2406 = vmatmul.mubr.msk.f32.gmra.mxu0 %vm446_vm0, %v503_v52 }
 0x156   : > { %2408 = vmatprep.mubr.msk.f32.mxu0 %vm2679_vm1, %v2678_v23 }
 0x159   : > { %2409 = vmatmul.mubr.msk.f32.gmra.mxu0 %vm446_vm0, %v504_v55 }
 0x15a   : > { %2432 = vmatprep.mubr.msk.f32.mxu0 %vm2679_vm1, %v2678_v23 }
 0x204   : > { %v591_v57 = vpop.f32.mrf.mxu0  ;;  %v684_v58 = vpop.f32.mrf.mxu1 }
 0x205   : > { %v2900_v16 = vadd.f32 %v2188_v10, %v591_v57  ;;  %v2919_v24 = vadd.f32 %v2197_v3, %v684_v58 }
 0x206   : > { %v2370_v60 = vpop.f32.mrf.mxu0  ;;  %v2387_v61 = vpop.f32.mrf.mxu1 }
 0x207   : > { %v799_v27 = vmul.f32 %v2210_v19, %v2900_v16  ;;  %v950_v29 = vmul.f32 %v2217_v22, %v2900_v16 }
 0x209   : > { %v596_v63 = vpop.f32.mrf.mxu0  ;;  %v689_v0 = vpop.f32.mrf.mxu1 }
 0x20a   : > { %v2895_v12 = vadd.f32 %v2197_v3, %v689_v0  ;;  %v2930_v30 = vadd.f32 %v2188_v10, %v596_v63 }
 0x20b   : > { %v2373_v1 = vpop.f32.mrf.mxu0  ;;  %v2390_v2 = vpop.f32.mrf.mxu1 }
 0x20c   : > { %v800_v38 = vmul.f32 %v2210_v19, %v2930_v30  ;;  %v951_v39 = vmul.f32 %v2217_v22, %v2930_v30 }
 0x20d   : > { %v601_v4 = vpop.f32.mrf.mxu0  ;;  %v694_v5 = vpop.f32.mrf.mxu1 }
 0x20e   : > { %v2878_v6 = vadd.f32 %v2197_v3, %v694_v5  ;;  %v2951_v41 = vadd.f32 %v2188_v10, %v601_v4 }
 0x20f   : > { %v2376_v7 = vpop.f32.mrf.mxu0  ;;  %v2393_v8 = vpop.f32.mrf.mxu1 }
 0x210   : > { %2412 = vmatpush3.xpose.msk.msra.mxu1 %vm446_vm0, %v2878_v6  ;;  %2427 = vmatpush3.xpose.msk.msra.mxu0 %vm446_vm0, %v2878_v6  ;;  %v801_v46 = vmul.f32 %v2210_v19, %v2951_v41  ;;  %v952_v47 = vmul.f32 %v2217_v22, %v2951_v41 }
 0x211   : > { %v777_v11 = vpop.f32.mrf.mxu0  ;;  %2413 = vmatprep.subr.mxu1 %v2678_v23  ;;  %2428 = vmatprep.subr.mxu0 %v2678_v23 }
 0x212   : > { %v778_v13 = vadd.f32 %v2206_v9, %v777_v11 }
 0x213   : > { %v2404_v15 = vpop.f32.mrf.mxu0 }
 0x214   : > { %2414 = vmatpush3.xpose.msk.msra.mxu1 %vm446_vm0, %v2895_v12  ;;  %2429 = vmatpush3.xpose.msk.msra.mxu0 %vm446_vm0, %v2895_v12  ;;  %v2910_v18 = vmul.f32 %v2898_v14, %v778_v13  ;;  %v2916_v21 = vmul.f32 %v2903_v17, %v778_v13  ;;  %v953_v44 = vmul.f32 %v2217_v22, %v778_v13 }
 0x215   : > { %v782_v20 = vpop.f32.mrf.mxu0  ;;  %2415 = vmatprep.subr.mxu1 %v2678_v23  ;;  %2430 = vmatprep.subr.mxu0 %v2678_v23  ;;  %v802_v45 = vmul.f32 %v2210_v19, %v778_v13 }
 0x216   : > { %v783_v25 = vadd.f32 %v2206_v9, %v782_v20 }
 0x217   : > { %v2407_v26 = vpop.f32.mrf.mxu0 }
 0x218   : > { %2416 = vmatpush3.xpose.msk.msra.mxu1 %vm446_vm0, %v2919_v24  ;;  %2431 = vmatpush3.xpose.msk.msra.mxu0 %vm446_vm0, %v2919_v24  ;;  %v2927_v28 = vmul.f32 %v2898_v14, %v783_v25  ;;  %v2935_v32 = vmul.f32 %v2903_v17, %v783_v25  ;;  %v954_v42 = vmul.f32 %v2217_v22, %v783_v25 }
 0x219   : > { %v787_v31 = vpop.f32.mrf.mxu0  ;;  %2441 = vmatprep.subr.mxu1 %v2678_v23  ;;  %2456 = vmatprep.subr.mxu0 %v2678_v23  ;;  %v803_v43 = vmul.f32 %v2210_v19, %v783_v25 }
 0x21a   : > { %v788_v33 = vadd.f32 %v2206_v9, %v787_v31 }
 0x21b   : > { %v2410_v34 = vpop.f32.mrf.mxu0  ;;  %2418 = vmatmul.mubr.msk.f32.vlgmr.msra.gmra.mxu1 %vm446_vm0, %v799_v27  ;;  %2433 = vmatmul.mubr.msk.f32.vlgmr.msra.gmra.mxu0 %vm446_vm0, %v950_v29 }
 0x21c   : > { %2420 = vmatprep.mubr.msk.f32.mxu1 %vm2679_vm1, %v2678_v23  ;;  %2435 = vmatprep.mubr.msk.f32.mxu0 %vm2679_vm1, %v2678_v23  ;;  %v955_v35 = vmul.f32 %v2217_v22, %v788_v33  ;;  %v804_v36 = vmul.f32 %v2210_v19, %v788_v33  ;;  %v2944_v37 = vmul.f32 %v2898_v14, %v788_v33 }
 0x21d   : > { %v2949_v40 = vmul.f32 %v2903_v17, %v788_v33 }
 0x21e   : > { %2442 = vmatpush3.msra.mxu1 %v955_v35  ;;  %2457 = vmatpush3.msra.mxu0 %v804_v36 }
 0x21f   : > { %2421 = vmatmul.mubr.msk.f32.gmra.mxu1 %vm446_vm0, %v800_v38  ;;  %2436 = vmatmul.mubr.msk.f32.gmra.mxu0 %vm446_vm0, %v951_v39 }
 0x220   : > { %2443 = vmatprep.subr.mxu1 %v2678_v23  ;;  %2458 = vmatprep.subr.mxu0 %v2678_v23 }
 0x221   : > { %2444 = vmatpush3.msra.mxu1 %v954_v42  ;;  %2459 = vmatpush3.msra.mxu0 %v803_v43 }
 0x222   : > { %2445 = vmatprep.subr.mxu1 %v2678_v23  ;;  %2460 = vmatprep.subr.mxu0 %v2678_v23 }
 0x223   : > { %2423 = vmatprep.mubr.msk.f32.mxu1 %vm2679_vm1, %v2678_v23  ;;  %2438 = vmatprep.mubr.msk.f32.mxu0 %vm2679_vm1, %v2678_v23 }
 0x224   : > { %2446 = vmatpush3.msra.mxu1 %v953_v44  ;;  %2461 = vmatpush3.msra.mxu0 %v802_v45 }
 0x225   : > { %2424 = vmatmul.mubr.msk.f32.gmra.mxu1 %vm446_vm0, %v801_v46  ;;  %2439 = vmatmul.mubr.msk.f32.gmra.mxu0 %vm446_vm0, %v952_v47 }
 0x226   : > { %2447 = vmatprep.mubr.msk.f32.mxu1 %vm2679_vm1, %v2678_v23  ;;  %2471 = vmatprep.subr.mxu1 %v2678_v23 }
 0x227   : > { %2462 = vmatprep.mubr.msk.f32.mxu0 %vm2679_vm1, %v2678_v23  ;;  %2486 = vmatprep.subr.mxu0 %v2678_v23 }
 0x2db   : > { %v889_v48 = vpop.f32.mrf.mxu1  ;;  %v1031_v49 = vpop.f32.mrf.mxu0 }
 0x2dc   : > { %v1045_v50 = vmul.f32 0.35355338, %v1031_v49  ;;  %v903_v26 = vmul.f32 0.35355338, %v889_v48 }
 0x2dd   : > { %v2419_v51 = vpop.f32.mrf.mxu1  ;;  %v2434_v52 = vpop.f32.mrf.mxu0 }
 0x2de   : > { %v1048_v53 = vsel %vm793_vm12, %v1045_v50, -1e+30  ;;  %v2987_v33 = vsel %vm793_vm12, %v903_v26, -1e+30 }
 0x2df   : > { %v894_v54 = vpop.f32.mrf.mxu1  ;;  %v1036_v55 = vpop.f32.mrf.mxu0  ;;  %v1051_v56 = vsel %vm911_vm13, %v1048_v53, -inf  ;;  %v912_v35 = vsel %vm911_vm13, %v2987_v33, -inf }
 0x2e0   : > { %v1046_v57 = vmul.f32 0.35355338, %v1036_v55  ;;  %1052 = vmax.xlane.f32.xlu0 %v1051_v56  ;;  %v904_v34 = vmul.f32 0.35355338, %v894_v54  ;;  %v1267_v54 = vmul.f32 %v2898_v14, %v2900_v16  ;;  %v1268_v55 = vmul.f32 %v2898_v14, %v2930_v30 }
 0x2e1   : > { %v2422_v58 = vpop.f32.mrf.mxu1  ;;  %v2437_v59 = vpop.f32.mrf.mxu0  ;;  %v1498_v56 = vmul.f32 %v2903_v17, %v2900_v16 }
 0x2e2   : > { %v1049_v60 = vsel %vm793_vm12, %v1046_v57, -1e+30  ;;  %v2998_v42 = vsel %vm793_vm12, %v904_v34, -1e+30 }
 0x2e3   : > { %v1054_v61 = vsel %vm911_vm13, %v1049_v60, -inf  ;;  %v915_v44 = vsel %vm911_vm13, %v2998_v42, -inf }
 0x2e4   : > { %1055 = vmax.xlane.f32.xlu1 %v1054_v61 }
 0x2e5   : > { %v899_v63 = vpop.f32.mrf.mxu1  ;;  %v1041_v0 = vpop.f32.mrf.mxu0 }
 0x2e6   : > { %v1047_v1 = vmul.f32 0.35355338, %v1041_v0  ;;  %v905_v31 = vmul.f32 0.35355338, %v899_v63 }
 0x2e7   : > { %v2425_v2 = vpop.f32.mrf.mxu1  ;;  %v2440_v3 = vpop.f32.mrf.mxu0 }
 0x2e8   : > { %v1050_v4 = vsel %vm793_vm12, %v1047_v1, -1e+30  ;;  %v2993_v38 = vsel %vm793_vm12, %v905_v31, -1e+30 }
 0x2e9   : > { %v1057_v5 = vsel %vm911_vm13, %v1050_v4, -inf  ;;  %v918_v43 = vsel %vm911_vm13, %v2993_v38, -inf }
 0x2ea   : > { %1058 = vmax.xlane.f32.xlu0 %v1057_v5 }
 0x369   : > { %v1053_v7 = vpop.xlane.xlu0 %1052 }
 0x36a   : > { %v1060_v8 = vsub.f32 %v1048_v53, %v1053_v7 }
 0x36c   : > { %v1063_v9 = vmul.f32 1.442695, %v1060_v8 }
 0x36d   : > { %v1056_v10 = vpop.xlane.xlu1 %1055 }
 0x36e   : > { %2607 = vpow2.f32 %v1063_v9  ;;  %v1061_v11 = vsub.f32 %v1049_v60, %v1056_v10 }
 0x370   : > { %v1065_v13 = vmul.f32 1.442695, %v1061_v11 }
 0x372   : > { %2609 = vpow2.f32 %v1065_v13 }
 0x373   : > { %v1059_v15 = vpop.xlane.xlu0 %1058 }
 0x374   : > { %v1062_v19 = vsub.f32 %v1050_v4, %v1059_v15 }
 0x376   : > { %v1067_v20 = vmul.f32 1.442695, %v1062_v19 }
 0x378   : > { %2611 = vpow2.f32 %v1067_v20 }
 0x37b   : > { %v2608_v22 = vpop.eup %2607 }
 0x37c   : > { %v1069_v25 = vsel %vm911_vm13, %v2608_v22, 0.0 }
 0x37d   : > { %1070 = vadd.xlane.f32.xlu1 %v1069_v25 }
 0x37f   : > { %v2610_v27 = vpop.eup %2609 }
 0x380   : > { %v1072_v29 = vsel %vm911_vm13, %v2610_v27, 0.0 }
 0x381   : > { %1073 = vadd.xlane.f32.xlu0 %v1072_v29 }
 0x385   : > { %v2612_v36 = vpop.eup %2611  ;;  %913 = vmax.xlane.f32.xlu0 %v912_v35 }
 0x386   : > { %v1075_v39 = vsel %vm911_vm13, %v2612_v36, 0.0 }
 0x387   : > { %1076 = vadd.xlane.f32.xlu1 %v1075_v39 }
 0x389   : > { %919 = vmax.xlane.f32.xlu0 %v918_v43 }
 0x38b   : > { %916 = vmax.xlane.f32.xlu1 %v915_v44 }
 0x406   : > { %v1071_v45 = vpop.xlane.xlu1 %1070 }
 0x407   : > { %2613 = vrcp.f32 %v1071_v45 }
 0x40a   : > { %v1074_v46 = vpop.xlane.xlu0 %1073 }
 0x40b   : > { %2615 = vrcp.f32 %v1074_v46 }
 0x410   : > { %v1077_v47 = vpop.xlane.xlu1 %1076 }
 0x411   : > { %2617 = vrcp.f32 %v1077_v47 }
 0x414   : > { %v2614_v48 = vpop.eup %2613 }
 0x415   : > { %v1081_v49 = vmul.f32 %v2614_v48, %v2608_v22 }
 0x417   : > { %2448 = vmatmul.mubr.msk.f32.vlgmr.msra.gmra.mxu1 %vm911_vm13, %v1081_v49 }
 0x418   : > { %v2616_v50 = vpop.eup %2615  ;;  %2472 = vmatpush3.xpose.msk.msra.mxu1 %vm446_vm0, %v2878_v6  ;;  %2450 = vmatprep.mubr.msk.f32.mxu1 %vm2679_vm1, %v2678_v23 }
 0x419   : > { %2473 = vmatprep.subr.mxu1 %v2678_v23  ;;  %v1082_v51 = vmul.f32 %v2616_v50, %v2610_v27 }
 0x41b   : > { %2451 = vmatmul.mubr.msk.f32.gmra.mxu1 %vm911_vm13, %v1082_v51 }
 0x41c   : > { %2474 = vmatpush3.xpose.msk.msra.mxu1 %vm446_vm0, %v2895_v12  ;;  %2453 = vmatprep.mubr.msk.f32.mxu1 %vm2679_vm1, %v2678_v23 }
 0x41d   : > { %2475 = vmatprep.subr.mxu1 %v2678_v23 }
 0x41e   : > { %v2618_v52 = vpop.eup %2617 }
 0x41f   : > { %v1083_v53 = vmul.f32 %v2618_v52, %v2612_v36 }
 0x420   : > { %2476 = vmatpush3.xpose.msk.msra.mxu1 %vm446_vm0, %v2919_v24 }
 0x421   : > { %2454 = vmatmul.mubr.msk.f32.gmra.mxu1 %vm911_vm13, %v1083_v53  ;;  %2501 = vmatprep.subr.mxu1 %v2678_v23 }
 0x422   : > { %2477 = vmatprep.mubr.msk.f32.mxu1 %vm2679_vm1, %v2678_v23 }
 0x425   : > { %2478 = vmatmul.mubr.msk.f32.vlgmr.msra.gmra.mxu1 %vm446_vm0, %v1267_v54 }
 0x426   : > { %2502 = vmatpush3.xpose.msk.msra.mxu1 %vm446_vm0, %v2878_v6  ;;  %2480 = vmatprep.mubr.msk.f32.mxu1 %vm2679_vm1, %v2678_v23  ;;  %v1269_v6 = vmul.f32 %v2898_v14, %v2951_v41  ;;  %v1500_v14 = vmul.f32 %v2903_v17, %v2951_v41 }
 0x427   : > { %2503 = vmatprep.subr.mxu1 %v2678_v23 }
 0x429   : > { %2481 = vmatmul.mubr.msk.f32.gmra.mxu1 %vm446_vm0, %v1268_v55 }
 0x42a   : > { %2504 = vmatpush3.xpose.msk.msra.mxu1 %vm446_vm0, %v2895_v12  ;;  %2483 = vmatprep.mubr.msk.f32.mxu1 %vm2679_vm1, %v2678_v23  ;;  %v1499_v12 = vmul.f32 %v2903_v17, %v2930_v30  ;;  %v914_v30 = vpop.xlane.xlu0 %913  ;;  %v917_v17 = vpop.xlane.xlu1 %916 }
 0x42b   : > { %2505 = vmatprep.subr.mxu1 %v2678_v23  ;;  %v921_v61 = vsub.f32 %v2987_v33, %v914_v30  ;;  %v922_v5 = vsub.f32 %v2998_v42, %v917_v17 }
 0x42d   : > { %2484 = vmatmul.mubr.msk.f32.gmra.mxu1 %vm446_vm0, %v1269_v6  ;;  %v924_v4 = vmul.f32 1.442695, %v921_v61  ;;  %v926_v15 = vmul.f32 1.442695, %v922_v5 }
 0x42e   : > { %2506 = vmatpush3.xpose.msk.msra.mxu1 %vm446_vm0, %v2919_v24  ;;  %2507 = vmatprep.mubr.msk.f32.mxu1 %vm2679_vm1, %v2678_v23  ;;  %v920_v63 = vpop.xlane.xlu0 %919 }
 0x42f   : > { %2531 = vmatprep.subr.mxu1 %v2678_v23  ;;  %v923_v2 = vsub.f32 %v2993_v38, %v920_v63  ;;  %2619 = vpow2.f32 %v924_v4 }
 0x431   : > { %2508 = vmatmul.mubr.msk.f32.vlgmr.msra.gmra.mxu1 %vm446_vm0, %v1498_v56  ;;  %v928_v11 = vmul.f32 1.442695, %v923_v2 }
 0x432   : > { %2510 = vmatprep.mubr.msk.f32.mxu1 %vm2679_vm1, %v2678_v23 }
 0x433   : > { %2621 = vpow2.f32 %v928_v11 }
 0x434   : > { %2623 = vpow2.f32 %v926_v15 }
 0x435   : > { %2511 = vmatmul.mubr.msk.f32.gmra.mxu1 %vm446_vm0, %v1499_v12 }
 0x436   : > { %2513 = vmatprep.mubr.msk.f32.mxu1 %vm2679_vm1, %v2678_v23 }
 0x439   : > { %2514 = vmatmul.mubr.msk.f32.gmra.mxu1 %vm446_vm0, %v1500_v14 }
 0x43a   : > { %2539 = vmatprep.mubr.msk.f32.mxu1 %vm2679_vm1, %v2678_v23 }
 0x43c   : > { %v2620_v45 = vpop.eup %2619 }
 0x43d   : > { %v930_v51 = vsel %vm911_vm13, %v2620_v45, 0.0 }
 0x440   : > { %v3087_v49 = vpop.eup %2621 }
 0x441   : > { %v3091_v52 = vpop.eup %2623  ;;  %v936_v54 = vsel %vm911_vm13, %v3087_v49, 0.0 }
 0x442   : > { %v933_v53 = vsel %vm911_vm13, %v3091_v52, 0.0 }
 0x4d7   : > { %v3061_v16 = vpop.f32.mrf.mxu1 }
 0x4d9   : > { %v2449_v24 = vpop.f32.mrf.mxu1 }
 0x4db   : > { %v3063_v57 = vpop.f32.mrf.mxu1 }
 0x4dd   : > { %v2452_v58 = vpop.f32.mrf.mxu1 }
 0x4e1   : > { %v3065_v59 = vpop.f32.mrf.mxu1 }
 0x4e3   : > { %v2455_v60 = vpop.f32.mrf.mxu1 }
 0x4e5   : > { %v1348_v0 = vpop.f32.mrf.mxu1 }
 0x4e6   : > { %v1362_v41 = vmul.f32 0.35355338, %v1348_v0 }
 0x4e7   : > { %v2479_v1 = vpop.f32.mrf.mxu1 }
 0x4e8   : > { %v1365_v3 = vsel %vm793_vm12, %v1362_v41, -1e+30 }
 0x4e9   : > { %v1353_v7 = vpop.f32.mrf.mxu1  ;;  %v1368_v8 = vsel %vm911_vm13, %v1365_v3, -inf }
 0x4ea   : > { %v1363_v9 = vmul.f32 0.35355338, %v1353_v7  ;;  %1369 = vmax.xlane.f32.xlu1 %v1368_v8 }
 0x4eb   : > { %v2482_v10 = vpop.f32.mrf.mxu1 }
 0x4ec   : > { %v1366_v13 = vsel %vm793_vm12, %v1363_v9, -1e+30 }
 0x4ed   : > { %v1358_v19 = vpop.f32.mrf.mxu1  ;;  %v1371_v20 = vsel %vm911_vm13, %v1366_v13, -inf }
 0x4ee   : > { %v1364_v22 = vmul.f32 0.35355338, %v1358_v19  ;;  %1372 = vmax.xlane.f32.xlu0 %v1371_v20 }
 0x4ef   : > { %v2485_v25 = vpop.f32.mrf.mxu1 }
 0x4f0   : > { %v1367_v26 = vsel %vm793_vm12, %v1364_v22, -1e+30 }
 0x4f1   : > { %v1579_v27 = vpop.f32.mrf.mxu1  ;;  %v1374_v29 = vsel %vm911_vm13, %v1367_v26, -inf }
 0x4f2   : > { %v1593_v31 = vmul.f32 0.35355338, %v1579_v27  ;;  %1375 = vmax.xlane.f32.xlu1 %v1374_v29 }
 0x4f3   : > { %v2509_v33 = vpop.f32.mrf.mxu1 }
 0x4f4   : > { %v1596_v34 = vsel %vm793_vm12, %v1593_v31, -1e+30 }
 0x4f5   : > { %v1584_v35 = vpop.f32.mrf.mxu1  ;;  %v1599_v36 = vsel %vm911_vm13, %v1596_v34, -inf }
 0x4f6   : > { %v1594_v38 = vmul.f32 0.35355338, %v1584_v35  ;;  %1600 = vmax.xlane.f32.xlu0 %v1599_v36 }
 0x4f7   : > { %v2512_v39 = vpop.f32.mrf.mxu1 }
 0x4f8   : > { %v1597_v42 = vsel %vm793_vm12, %v1594_v38, -1e+30 }
 0x4f9   : > { %v1589_v43 = vpop.f32.mrf.mxu1  ;;  %v1602_v44 = vsel %vm911_vm13, %v1597_v42, -inf }
 0x4fa   : > { %v1595_v46 = vmul.f32 0.35355338, %v1589_v43  ;;  %1603 = vmax.xlane.f32.xlu1 %v1602_v44 }
 0x4fb   : > { %v2515_v47 = vpop.f32.mrf.mxu1 }
 0x4fc   : > { %v1598_v48 = vsel %vm793_vm12, %v1595_v46, -1e+30 }
 0x4fd   : > { %v1605_v50 = vsel %vm911_vm13, %v1598_v48, -inf }
 0x4fe   : > { %1606 = vmax.xlane.f32.xlu0 %v1605_v50  ;;  %931 = vadd.xlane.f32.xlu1 %v930_v51 }
 0x502   : > { %934 = vadd.xlane.f32.xlu0 %v933_v53  ;;  %937 = vadd.xlane.f32.xlu1 %v936_v54 }
 0x573   : > { %v1370_v62 = vpop.xlane.xlu1 %1369 }
 0x574   : > { %v1377_v55 = vsub.f32 %v1365_v3, %v1370_v62 }
 0x576   : > { %v1380_v6 = vmul.f32 1.442695, %v1377_v55 }
 0x577   : > { %v1373_v56 = vpop.xlane.xlu0 %1372 }
 0x578   : > { %2625 = vpow2.f32 %v1380_v6  ;;  %v1378_v12 = vsub.f32 %v1366_v13, %v1373_v56  ;;  %v1727_v56 = vld [vmem:[%s3284_s5 + $0x18] sm:$0xff] }
 0x579   : > { %2532 = vmatpush3.msra.mxu1 %v1727_v56 }
 0x57a   : > { %v1382_v14 = vmul.f32 1.442695, %v1378_v12  ;;  %v1726_v12 = vld [vmem:[%s3284_s5 + $0x10] sm:$0xff]  ;;  %2533 = vmatprep.subr.mxu1 %v2678_v23 }
 0x57b   : > { %v1376_v24 = vpop.xlane.xlu1 %1375  ;;  %2534 = vmatpush3.msra.mxu1 %v1726_v12 }
 0x57c   : > { %2627 = vpow2.f32 %v1382_v14  ;;  %v1379_v58 = vsub.f32 %v1367_v26, %v1376_v24  ;;  %2535 = vmatprep.subr.mxu1 %v2678_v23  ;;  %v1725_v14 = vld [vmem:[%s3284_s5 + $0x8] sm:$0xff]  ;;  %v1724_v24 = vld [vmem:[%s3284_s5] sm:$0xff] }
 0x57d   : > { %2536 = vmatpush3.msra.mxu1 %v1725_v14 }
 0x57e   : > { %v1384_v30 = vmul.f32 1.442695, %v1379_v58  ;;  %2537 = vmatprep.subr.mxu1 %v2678_v23 }
 0x57f   : > { %v1601_v60 = vpop.xlane.xlu0 %1600  ;;  %2538 = vmatpush3.msra.mxu1 %v1724_v24 }
 0x580   : > { %2629 = vpow2.f32 %v1384_v30  ;;  %v1608_v61 = vsub.f32 %v1596_v34, %v1601_v60  ;;  %2565 = vmatprep.subr.mxu1 %v2678_v23 }
 0x582   : > { %v1611_v63 = vmul.f32 1.442695, %v1608_v61 }
 0x583   : > { %v1604_v0 = vpop.xlane.xlu1 %1603 }
 0x584   : > { %2631 = vpow2.f32 %v1611_v63  ;;  %v1609_v17 = vsub.f32 %v1597_v42, %v1604_v0 }
 0x585   : > { %v2626_v41 = vpop.eup %2625 }
 0x586   : > { %v1613_v1 = vmul.f32 1.442695, %v1609_v17  ;;  %v1386_v2 = vsel %vm911_vm13, %v2626_v41, 0.0 }
 0x587   : > { %1387 = vadd.xlane.f32.xlu0 %v1386_v2  ;;  %v932_v3 = vpop.xlane.xlu1 %931  ;;  %v1607_v4 = vpop.xlane.xlu0 %1606 }
 0x588   : > { %2633 = vpow2.f32 %v1613_v1  ;;  %v1610_v5 = vsub.f32 %v1598_v48, %v1607_v4 }
 0x589   : > { %v2628_v7 = vpop.eup %2627  ;;  %2635 = vrcp.f32 %v932_v3 }
 0x58a   : > { %v1615_v8 = vmul.f32 1.442695, %v1610_v5  ;;  %v1389_v9 = vsel %vm911_vm13, %v2628_v7, 0.0 }
 0x58b   : > { %1390 = vadd.xlane.f32.xlu1 %v1389_v9  ;;  %v935_v10 = vpop.xlane.xlu0 %934  ;;  %v938_v13 = vpop.xlane.xlu1 %937 }
 0x58c   : > { %2637 = vpow2.f32 %v1615_v8 }
 0x58d   : > { %v2630_v11 = vpop.eup %2629  ;;  %2639 = vrcp.f32 %v935_v10 }
 0x58e   : > { %v1392_v15 = vsel %vm911_vm13, %v2630_v11, 0.0  ;;  %2641 = vrcp.f32 %v938_v13 }
 0x58f   : > { %1393 = vadd.xlane.f32.xlu0 %v1392_v15 }
 0x591   : > { %v2632_v19 = vpop.eup %2631 }
 0x592   : > { %v1617_v20 = vsel %vm911_vm13, %v2632_v19, 0.0 }
 0x593   : > { %1618 = vadd.xlane.f32.xlu1 %v1617_v20 }
 0x595   : > { %v2634_v22 = vpop.eup %2633 }
 0x596   : > { %v2636_v25 = vpop.eup %2635  ;;  %v1620_v26 = vsel %vm911_vm13, %v2634_v22, 0.0 }
 0x597   : > { %v942_v27 = vmul.f32 %v2636_v25, %v2620_v45  ;;  %1621 = vadd.xlane.f32.xlu0 %v1620_v26 }
 0x599   : > { %v2638_v29 = vpop.eup %2637  ;;  %2463 = vmatmul.mubr.msk.f32.vlgmr.msra.gmra.mxu0 %vm911_vm13, %v942_v27 }
 0x59a   : > { %2487 = vmatpush3.msra.mxu0 %v2944_v37  ;;  %2465 = vmatprep.mubr.msk.f32.mxu0 %vm2679_vm1, %v2678_v23  ;;  %v1623_v31 = vsel %vm911_vm13, %v2638_v29, 0.0  ;;  %v2640_v33 = vpop.eup %2639 }
 0x59b   : > { %2488 = vmatprep.subr.mxu0 %v2678_v23  ;;  %1624 = vadd.xlane.f32.xlu1 %v1623_v31  ;;  %v943_v34 = vmul.f32 %v2640_v33, %v3091_v52  ;;  %v2642_v35 = vpop.eup %2641  ;;  %v2668_v33 = vld [vmem:[%s2766_s30 + $0x8] sm:$0xff] }
 0x59c   : > { %2489 = vmatpush3.msra.mxu0 %v2927_v28  ;;  %v944_v37 = vmul.f32 %v2642_v35, %v3087_v49 }
 0x59d   : > { %2490 = vmatprep.subr.mxu0 %v2678_v23  ;;  %2466 = vmatmul.mubr.msk.f32.gmra.mxu0 %vm911_vm13, %v943_v34 }
 0x59e   : > { %2491 = vmatpush3.msra.mxu0 %v2910_v18  ;;  %2468 = vmatprep.mubr.msk.f32.mxu0 %vm2679_vm1, %v2678_v23 }
 0x59f   : > { %2516 = vmatprep.subr.mxu0 %v2678_v23 }
 0x5a1   : > { %2469 = vmatmul.mubr.msk.f32.gmra.mxu0 %vm911_vm13, %v944_v37 }
 0x5a2   : > { %2492 = vmatprep.mubr.msk.f32.mxu0 %vm2679_vm1, %v2678_v23 }
 0x610   : > { %v1388_v28 = vpop.xlane.xlu0 %1387 }
 0x611   : > { %2643 = vrcp.f32 %v1388_v28 }
 0x614   : > { %v1391_v36 = vpop.xlane.xlu1 %1390 }
 0x615   : > { %2645 = vrcp.f32 %v1391_v36 }
 0x618   : > { %v1394_v38 = vpop.xlane.xlu0 %1393 }
 0x619   : > { %2647 = vrcp.f32 %v1394_v38  ;;  %v2669_v38 = vld [vmem:[%s2766_s30 + $0x10] sm:$0xff] }
 0x61c   : > { %v1619_v39 = vpop.xlane.xlu1 %1618 }
 0x61d   : > { %2649 = vrcp.f32 %v1619_v39 }
 0x61e   : > { %v2644_v18 = vpop.eup %2643 }
 0x61f   : > { %v1398_v42 = vmul.f32 %v2644_v18, %v2626_v41 }
 0x620   : > { %v1622_v43 = vpop.xlane.xlu0 %1621 }
 0x621   : > { %2651 = vrcp.f32 %v1622_v43  ;;  %2493 = vmatmul.mubr.msk.f32.vlgmr.msra.gmra.mxu0 %vm911_vm13, %v1398_v42 }
 0x622   : > { %v2646_v44 = vpop.eup %2645  ;;  %2517 = vmatpush3.msra.mxu0 %v2949_v40  ;;  %2495 = vmatprep.mubr.msk.f32.mxu0 %vm2679_vm1, %v2678_v23 }
 0x623   : > { %2518 = vmatprep.subr.mxu0 %v2678_v23  ;;  %v1399_v45 = vmul.f32 %v2646_v44, %v2628_v7 }
 0x624   : > { %2519 = vmatpush3.msra.mxu0 %v2935_v32  ;;  %v1625_v46 = vpop.xlane.xlu1 %1624 }
 0x625   : > { %2653 = vrcp.f32 %v1625_v46  ;;  %2520 = vmatprep.subr.mxu0 %v2678_v23  ;;  %2496 = vmatmul.mubr.msk.f32.gmra.mxu0 %vm911_vm13, %v1399_v45 }
 0x626   : > { %v2648_v47 = vpop.eup %2647  ;;  %2521 = vmatpush3.msra.mxu0 %v2916_v21  ;;  %2498 = vmatprep.mubr.msk.f32.mxu0 %vm2679_vm1, %v2678_v23 }
 0x627   : > { %v1400_v40 = vmul.f32 %v2648_v47, %v2630_v11  ;;  %2548 = vmatprep.subr.mxu0 %v2678_v23 }
 0x629   : > { %2499 = vmatmul.mubr.msk.f32.gmra.mxu0 %vm911_vm13, %v1400_v40 }
 0x62a   : > { %v2650_v48 = vpop.eup %2649  ;;  %2522 = vmatprep.mubr.msk.f32.mxu0 %vm2679_vm1, %v2678_v23 }
 0x62b   : > { %v1629_v32 = vmul.f32 %v2650_v48, %v2632_v19 }
 0x62d   : > { %2523 = vmatmul.mubr.msk.f32.vlgmr.msra.gmra.mxu0 %vm911_vm13, %v1629_v32 }
 0x62e   : > { %v2652_v49 = vpop.eup %2651  ;;  %2525 = vmatprep.mubr.msk.f32.mxu0 %vm2679_vm1, %v2678_v23 }
 0x62f   : > { %v1630_v21 = vmul.f32 %v2652_v49, %v2634_v22  ;;  %v2667_v22 = vld [vmem:[%s2766_s30] sm:$0xff] }
 0x631   : > { %2526 = vmatmul.mubr.msk.f32.gmra.mxu0 %vm911_vm13, %v1630_v21 }
 0x632   : > { %v2654_v50 = vpop.eup %2653  ;;  %2528 = vmatprep.mubr.msk.f32.mxu0 %vm2679_vm1, %v2678_v23 }
 0x633   : > { %v1631_v51 = vmul.f32 %v2654_v50, %v2638_v29 }
 0x635   : > { %2529 = vmatmul.mubr.msk.f32.gmra.mxu0 %vm911_vm13, %v1631_v51 }
 0x636   : > { %2556 = vmatprep.mubr.msk.f32.mxu0 %vm2679_vm1, %v2678_v23 }
 0x659   : > { %v1248_v52 = vpop.f32.mrf.mxu0 }
 0x65a   : > { %v1249_v0 = vadd.f32 %v1248_v52, %v3061_v16 }
 0x65b   : > { %v2464_v53 = vpop.f32.mrf.mxu0 }
 0x65d   : > { %v1253_v54 = vpop.f32.mrf.mxu0 }
 0x65e   : > { %v1254_v2 = vadd.f32 %v1253_v54, %v3063_v57  ;;  %v1889_v54 = vld [vmem:[%s3288_s9 + $0x18] sm:$0xff] }
 0x65f   : > { %v2467_v62 = vpop.f32.mrf.mxu0  ;;  %2549 = vmatpush3.msra.mxu0 %v1889_v54 }
 0x660   : > { %v1888_v62 = vld [vmem:[%s3288_s9 + $0x10] sm:$0xff]  ;;  %2550 = vmatprep.subr.mxu0 %v2678_v23 }
 0x661   : > { %v1258_v55 = vpop.f32.mrf.mxu0  ;;  %2551 = vmatpush3.msra.mxu0 %v1888_v62 }
 0x662   : > { %v1259_v8 = vadd.f32 %v1258_v55, %v3065_v59  ;;  %v2250_v59 = vld [vmem:[%s3285_s6] ss:$0 sm:$0xff]  ;;  %v1887_v55 = vld [vmem:[%s3288_s9 + $0x8] sm:$0xff]  ;;  %2552 = vmatprep.subr.mxu0 %v2678_v23 }
 0x663   : > { %v2470_v6 = vpop.f32.mrf.mxu0  ;;  %2553 = vmatpush3.msra.mxu0 %v1887_v55 }
 0x664   : > { %v1886_v6 = vld [vmem:[%s3288_s9] sm:$0xff]  ;;  %2554 = vmatprep.subr.mxu0 %v2678_v23 }
 0x665   : > { %2555 = vmatpush3.msra.mxu0 %v1886_v6 }
 0x6e1   : > { %v1476_v58 = vpop.f32.mrf.mxu0 }
 0x6e2   : > { %v1490_v41 = vadd.f32 %v1476_v58, %v1249_v0 }
 0x6e3   : > { %v2494_v30 = vpop.f32.mrf.mxu0 }
 0x6e5   : > { %v1481_v60 = vpop.f32.mrf.mxu0 }
 0x6e6   : > { %v1491_v5 = vadd.f32 %v1481_v60, %v1254_v2 }
 0x6e7   : > { %v2497_v61 = vpop.f32.mrf.mxu0 }
 0x6e9   : > { %v1486_v63 = vpop.f32.mrf.mxu0 }
 0x6ea   : > { %v1492_v16 = vadd.f32 %v1486_v63, %v1259_v8 }
 0x6eb   : > { %v2500_v17 = vpop.f32.mrf.mxu0 }
 0x6ec   : > { %v2254_v17 = vld [vmem:[%s3286_s7] ss:$0 sm:$0xff] }
 0x6ed   : > { %v1707_v1 = vpop.f32.mrf.mxu0 }
 0x6ee   : > { %v1721_v3 = vadd.f32 %v1707_v1, %v1490_v41  ;;  %v2255_v1 = vld [vmem:[%s3287_s8] ss:$0 sm:$0xff] }
 0x6ef   : > { %v2524_v4 = vpop.f32.mrf.mxu0 }
 0x6f0   : > { %2540 = vmatmul.mubr.msk.f32.vlgmr.msra.gmra.mxu1 %vm446_vm0, %v1721_v3 }
 0x6f1   : > { %v1712_v7 = vpop.f32.mrf.mxu0  ;;  %2542 = vmatprep.mubr.msk.f32.mxu1 %vm2679_vm1, %v2678_v23 }
 0x6f2   : > { %v1722_v9 = vadd.f32 %v1712_v7, %v1491_v5 }
 0x6f3   : > { %v2527_v10 = vpop.f32.mrf.mxu0 }
 0x6f4   : > { %2543 = vmatmul.mubr.msk.f32.gmra.mxu1 %vm446_vm0, %v1722_v9 }
 0x6f5   : > { %v1717_v11 = vpop.f32.mrf.mxu0  ;;  %2545 = vmatprep.mubr.msk.f32.mxu1 %vm2679_vm1, %v2678_v23 }
 0x6f6   : > { %v1723_v57 = vadd.f32 %v1717_v11, %v1492_v16 }
 0x6f7   : > { %v2530_v13 = vpop.f32.mrf.mxu0 }
 0x6f8   : > { %2546 = vmatmul.mubr.msk.f32.gmra.mxu1 %vm446_vm0, %v1723_v57  ;;  %v2020_v57 = vld [vmem:[%s3290_s11 + $0x38] sm:$0xff]  ;;  %v2019_v13 = vld [vmem:[%s3290_s11 + $0x30] sm:$0xff] }
 0x6f9   : > { %2581 = vmatprep.mubr.msk.f32.mxu1 %vm2679_vm1, %v2678_v23  ;;  %2566 = vmatpush3.msra.mxu1 %v2020_v57 }
 0x6fa   : > { %2567 = vmatprep.subr.mxu1 %v2678_v23 }
 0x6fb   : > { %2568 = vmatpush3.msra.mxu1 %v2019_v13 }
 0x6fc   : > { %2569 = vmatprep.subr.mxu1 %v2678_v23 }
 0x7b0   : > { %v1810_v15 = vpop.f32.mrf.mxu1 }
 0x7b1   : > { %v1811_v19 = vadd.f32 %v2250_v59, %v1810_v15  ;;  %v2017_v15 = vld [vmem:[%s3290_s11 + $0x20] sm:$0xff] }
 0x7b2   : > { %v2541_v20 = vpop.f32.mrf.mxu1 }
 0x7b3   : > { %v3176_v25 = vadd.f32 %v2667_v22, %v1811_v19  ;;  %v2016_v19 = vld [vmem:[%s3290_s11 + $0x18] sm:$0xff]  ;;  %v2015_v20 = vld [vmem:[%s3290_s11 + $0x10] sm:$0xff]  ;;  %v2014_v22 = vld [vmem:[%s3290_s11 + $0x8] sm:$0xff] }
 0x7b4   : > { %v1815_v26 = vpop.f32.mrf.mxu1 }
 0x7b5   : > { %v1816_v27 = vadd.f32 %v2250_v59, %v1815_v26  ;;  %v1829_v29 = vsel %vm446_vm0, %v3176_v25, 0.0  ;;  %v2013_v26 = vld [vmem:[%s3290_s11] sm:$0xff] }
 0x7b6   : > { %1830 = vadd.xlane.f32.xlu0 %v1829_v29  ;;  %v2544_v31 = vpop.f32.mrf.mxu1 }
 0x7b7   : > { %v3181_v34 = vadd.f32 %v2668_v33, %v1816_v27  ;;  %v2256_v27 = vld [vmem:[%s3289_s10] ss:$0 sm:$0xff] }
 0x7b8   : > { %v1820_v35 = vpop.f32.mrf.mxu1 }
 0x7b9   : > { %v1821_v37 = vadd.f32 %v2250_v59, %v1820_v35  ;;  %v1832_v28 = vsel %vm446_vm0, %v3181_v34, 0.0  ;;  %v2018_v59 = vld [vmem:[%s3290_s11 + $0x28] sm:$0xff] }
 0x7ba   : > { %1833 = vadd.xlane.f32.xlu1 %v1832_v28  ;;  %v2547_v36 = vpop.f32.mrf.mxu1  ;;  %2570 = vmatpush3.msra.mxu1 %v2018_v59 }
 0x7bb   : > { %v3186_v39 = vadd.f32 %v2669_v38, %v1821_v37  ;;  %2571 = vmatprep.subr.mxu1 %v2678_v23 }
 0x7bc   : > { %2572 = vmatpush3.msra.mxu1 %v2017_v15 }
 0x7bd   : > { %v1835_v18 = vsel %vm446_vm0, %v3186_v39, 0.0  ;;  %2573 = vmatprep.subr.mxu1 %v2678_v23 }
 0x7be   : > { %1836 = vadd.xlane.f32.xlu0 %v1835_v18  ;;  %2574 = vmatpush3.msra.mxu1 %v2016_v19 }
 0x7bf   : > { %2575 = vmatprep.subr.mxu1 %v2678_v23 }
 0x7c0   : > { %2576 = vmatpush3.msra.mxu1 %v2015_v20 }
 0x7c1   : > { %2577 = vmatprep.subr.mxu1 %v2678_v23 }
 0x7c2   : > { %2578 = vmatpush3.msra.mxu1 %v2014_v22 }
 0x7c3   : > { %2579 = vmatprep.subr.mxu1 %v2678_v23 }
 0x7c4   : > { %2580 = vmatpush3.msra.mxu1 %v2013_v26 }
 0x83f   : > { %v1831_v42 = vpop.xlane.xlu0 %1830 }
 0x840   : > { %v1838_v43 = vmul.f32 0.03125, %v1831_v42 }
 0x842   : > { %v1841_v44 = vsub.f32 %v3176_v25, %v1838_v43 }
 0x843   : > { %v1834_v45 = vpop.xlane.xlu1 %1833 }
 0x844   : > { %v1839_v46 = vmul.f32 0.03125, %v1834_v45  ;;  %v1844_v47 = vmul.f32 %v1841_v44, %v1841_v44 }
 0x846   : > { %v1842_v40 = vsub.f32 %v3181_v34, %v1839_v46  ;;  %v1847_v48 = vsel %vm446_vm0, %v1844_v47, 0.0 }
 0x847   : > { %1848 = vadd.xlane.f32.xlu1 %v1847_v48  ;;  %v1837_v32 = vpop.xlane.xlu0 %1836 }
 0x848   : > { %v1840_v49 = vmul.f32 0.03125, %v1837_v32  ;;  %v1845_v21 = vmul.f32 %v1842_v40, %v1842_v40 }
 0x84a   : > { %v1843_v50 = vsub.f32 %v3186_v39, %v1840_v49  ;;  %v1850_v51 = vsel %vm446_vm0, %v1845_v21, 0.0 }
 0x84b   : > { %1851 = vadd.xlane.f32.xlu0 %v1850_v51 }
 0x84c   : > { %v1846_v52 = vmul.f32 %v1843_v50, %v1843_v50 }
 0x84e   : > { %v1853_v53 = vsel %vm446_vm0, %v1846_v52, 0.0 }
 0x84f   : > { %1854 = vadd.xlane.f32.xlu1 %v1853_v53 }
 0x8d0   : > { %v1849_v56 = vpop.xlane.xlu1 %1848 }
 0x8d1   : > { %v1856_v12 = vmul.f32 0.03125, %v1849_v56 }
 0x8d3   : > { %v1859_v14 = vadd.f32 1e-05, %v1856_v12 }
 0x8d4   : > { %v1852_v24 = vpop.xlane.xlu0 %1851 }
 0x8d5   : > { %2655 = vrsqrt.f32 %v1859_v14  ;;  %v1857_v58 = vmul.f32 0.03125, %v1852_v24 }
 0x8d7   : > { %v1860_v30 = vadd.f32 1e-05, %v1857_v58 }
 0x8d8   : > { %v1855_v60 = vpop.xlane.xlu1 %1854 }
 0x8d9   : > { %2657 = vrsqrt.f32 %v1860_v30  ;;  %v1858_v61 = vmul.f32 0.03125, %v1855_v60 }
 0x8db   : > { %v1861_v63 = vadd.f32 1e-05, %v1858_v61 }
 0x8dd   : > { %2659 = vrsqrt.f32 %v1861_v63  ;;  %v2260_v63 = vld [vmem:[%s3291_s12] ss:$0 sm:$0xff] }
 0x8e2   : > { %v2656_v0 = vpop.eup %2655 }
 0x8e3   : > { %v1865_v41 = vmul.f32 %v2656_v0, %v1841_v44 }
 0x8e5   : > { %v1874_v2 = vmul.f32 %v2254_v17, %v1865_v41 }
 0x8e6   : > { %v2658_v3 = vpop.eup %2657 }
 0x8e7   : > { %v1883_v4 = vadd.f32 %v2255_v1, %v1874_v2  ;;  %v1866_v5 = vmul.f32 %v2658_v3, %v1842_v40 }
 0x8e9   : > { %2557 = vmatmul.mubr.msk.f32.vlgmr.msra.gmra.mxu0 %vm446_vm0, %v1883_v4  ;;  %v1875_v7 = vmul.f32 %v2254_v17, %v1866_v5 }
 0x8ea   : > { %v2660_v8 = vpop.eup %2659  ;;  %2559 = vmatprep.mubr.msk.f32.mxu0 %vm2679_vm1, %v2678_v23 }
 0x8eb   : > { %v1884_v9 = vadd.f32 %v2255_v1, %v1875_v7  ;;  %v1867_v10 = vmul.f32 %v2660_v8, %v1843_v50 }
 0x8ed   : > { %2560 = vmatmul.mubr.msk.f32.gmra.mxu0 %vm446_vm0, %v1884_v9  ;;  %v1876_v16 = vmul.f32 %v2254_v17, %v1867_v10 }
 0x8ee   : > { %2562 = vmatprep.mubr.msk.f32.mxu0 %vm2679_vm1, %v2678_v23 }
 0x8ef   : > { %v1885_v11 = vadd.f32 %v2255_v1, %v1876_v16 }
 0x8f1   : > { %2563 = vmatmul.mubr.msk.f32.gmra.mxu0 %vm446_vm0, %v1885_v11 }
 0x9a9   : > { %v1972_v29 = vpop.f32.mrf.mxu0 }
 0x9aa   : > { %v1973_v31 = vadd.f32 %v2256_v27, %v1972_v29 }
 0x9ab   : > { %v2558_v33 = vpop.f32.mrf.mxu0 }
 0x9ac   : > { %v1986_v35 = vmul.f32 %v1973_v31, %v1973_v31 }
 0x9ad   : > { %v1977_v37 = vpop.f32.mrf.mxu0 }
 0x9ae   : > { %v1989_v28 = vmul.f32 %v1986_v35, %v1973_v31  ;;  %v1978_v36 = vadd.f32 %v2256_v27, %v1977_v37 }
 0x9af   : > { %v2561_v38 = vpop.f32.mrf.mxu0 }
 0x9b0   : > { %v1992_v18 = vmul.f32 0.044715, %v1989_v28  ;;  %v1987_v42 = vmul.f32 %v1978_v36, %v1978_v36 }
 0x9b1   : > { %v1982_v43 = vpop.f32.mrf.mxu0 }
 0x9b2   : > { %v1995_v44 = vadd.f32 %v1992_v18, %v1973_v31  ;;  %v1990_v45 = vmul.f32 %v1987_v42, %v1978_v36  ;;  %v1983_v46 = vadd.f32 %v2256_v27, %v1982_v43 }
 0x9b3   : > { %v2564_v47 = vpop.f32.mrf.mxu0 }
 0x9b4   : > { %v1998_v40 = vmul.f32 0.7978846, %v1995_v44  ;;  %v1993_v48 = vmul.f32 0.044715, %v1990_v45  ;;  %v1988_v32 = vmul.f32 %v1983_v46, %v1983_v46 }
 0x9b6   : > { %2661 = vtanh.f32 %v1998_v40  ;;  %v1996_v49 = vadd.f32 %v1993_v48, %v1978_v36  ;;  %v1991_v21 = vmul.f32 %v1988_v32, %v1983_v46 }
 0x9b8   : > { %v1999_v50 = vmul.f32 0.7978846, %v1996_v49  ;;  %v1994_v51 = vmul.f32 0.044715, %v1991_v21 }
 0x9ba   : > { %2663 = vtanh.f32 %v1999_v50  ;;  %v1997_v52 = vadd.f32 %v1994_v51, %v1983_v46 }
 0x9bc   : > { %v2000_v53 = vmul.f32 0.7978846, %v1997_v52 }
 0x9be   : > { %2665 = vtanh.f32 %v2000_v53 }
 0x9c3   : > { %v2662_v54 = vpop.eup %2661 }
 0x9c4   : > { %v2004_v62 = vadd.f32 1.0, %v2662_v54 }
 0x9c6   : > { %v2007_v55 = vmul.f32 0.5, %v2004_v62 }
 0x9c7   : > { %v2664_v6 = vpop.eup %2663 }
 0x9c8   : > { %v2010_v56 = vmul.f32 %v2007_v55, %v1973_v31  ;;  %v2005_v12 = vadd.f32 1.0, %v2664_v6 }
 0x9ca   : > { %2582 = vmatmul.mubr.msk.f32.vlgmr.msra.gmra.mxu1 %vm2028_vm14, %v2010_v56  ;;  %v2008_v14 = vmul.f32 0.5, %v2005_v12 }
 0x9cb   : > { %v2666_v24 = vpop.eup %2665  ;;  %2584 = vmatprep.mubr.msk.f32.mxu1 %vm2679_vm1, %v2678_v23 }
 0x9cc   : > { %v2011_v58 = vmul.f32 %v2008_v14, %v1978_v36  ;;  %v2006_v30 = vadd.f32 1.0, %v2666_v24 }
 0x9ce   : > { %2585 = vmatmul.mubr.msk.f32.gmra.mxu1 %vm2028_vm14, %v2011_v58  ;;  %v2009_v60 = vmul.f32 0.5, %v2006_v30 }
 0x9cf   : > { %2587 = vmatprep.mubr.msk.f32.mxu1 %vm2679_vm1, %v2678_v23 }
 0x9d0   : > { %v2012_v61 = vmul.f32 %v2009_v60, %v1983_v46 }
 0x9d2   : > { %2588 = vmatmul.mubr.msk.f32.gmra.mxu1 %vm2028_vm14, %v2012_v61 }
 0xa8a   : > { %v2104_v0 = vpop.f32.mrf.mxu1 }
 0xa8b   : > { %v2105_v17 = vadd.f32 %v2260_v63, %v2104_v0 }
 0xa8c   : > { %v2583_v41 = vpop.f32.mrf.mxu1 }
 0xa8d   : > { %v2118_v1 = vadd.f32 %v2105_v17, %v3176_v25 }
 0xa8e   : > { %v2109_v2 = vpop.f32.mrf.mxu1 }
 0xa8f   : > { %2121 = vst.msk [vmem:[%s440_s24] sm:$0xff] %vm446_vm0, %v2118_v1  ;;  %v2110_v23 = vadd.f32 %v2260_v63, %v2109_v2 }
 0xa90   : > { %v2586_v3 = vpop.f32.mrf.mxu1 }
 0xa91   : > { %v2119_v4 = vadd.f32 %v2110_v23, %v3181_v34 }
 0xa92   : > { %v2114_v5 = vpop.f32.mrf.mxu1 }
 0xa93   : > { %2122 = vst.msk [vmem:[%s440_s24 + $0x8] sm:$0xff] %vm446_vm0, %v2119_v4  ;;  %v2115_v7 = vadd.f32 %v2260_v63, %v2114_v5 }
 0xa94   : > { %v2589_v8 = vpop.f32.mrf.mxu1 }
 0xa95   : > { %v2120_v9 = vadd.f32 %v2115_v7, %v3186_v39 }
 0xa97   : > { %2123 = vst.msk [vmem:[%s440_s24 + $0x10] sm:$0xff] %vm446_vm0, %v2120_v9 }
 0xa98 PF: > { %s23_s25 = sadd.s32 1, %s2676_s25  }
 0xa99   : > { %p20_p4 = scmp.ge.s32.totalorder %s23_s25, 4  }
 0xa9b   :  { %22 = sbr.rel (!%p20_p4) target bundleno = 1 (0x1), region = 106 }

</bundles_post_ra>
